<compile_context>
chip_gen: v7x
topology: tpu7x:2x2x1
jax: 0.10.0
libtpu: 0.0.40
codegen_flags: <defaults>
</compile_context>

<pallas_src>
import jax
import jax.numpy as jnp
from jax.experimental import pallas as pl
from jax.experimental.pallas import tpu as pltpu

# True layer dims of the PyTorch module (Linear + ReLU after *every* layer,
# including the last one, exactly as in the spec's nn.Sequential).
LAYER_DIMS = [28 * 28, 512, 512, 256, 64, 10]
# Lane-padded dims (last-dim multiples of 128); padding is zeros so it does
# not change the math (relu(0 + 0) == 0 propagates cleanly).
PADDED_DIMS = [896, 512, 512, 256, 128, 128]


def _round_up(x, m):
    return (x + m - 1) // m * m


def _mlp_kernel(x_ref,
                w1_ref, b1_ref,
                w2_ref, b2_ref,
                w3_ref, b3_ref,
                w4_ref, b4_ref,
                w5_ref, b5_ref,
                out_ref):
    """One batch tile of the full MLP: 5x (bf16 matmul -> f32 bias+ReLU)."""
    h = x_ref[...]  # (TILE_B, 896) f32

    def layer(h, w_ref, b_ref):
        # bf16 x bf16 -> f32 accumulate on the MXU; epilogue in f32 on the VPU.
        y = jnp.dot(h.astype(jnp.bfloat16), w_ref[...],
                    preferred_element_type=jnp.float32)
        y = y + b_ref[...]          # (1, dout) broadcasts over the batch tile
        return jnp.maximum(y, 0.0)  # ReLU after every Linear (matches module)

    h = layer(h, w1_ref, b1_ref)
    h = layer(h, w2_ref, b2_ref)
    h = layer(h, w3_ref, b3_ref)
    h = layer(h, w4_ref, b4_ref)
    h = layer(h, w5_ref, b5_ref)

    out_ref[...] = h.astype(out_ref.dtype)


def init_params(key):
    """PyTorch nn.Linear default init: U(-1/sqrt(fan_in), 1/sqrt(fan_in)). f32, true shapes."""
    params = []
    for i in range(len(LAYER_DIMS) - 1):
        fan_in, fan_out = LAYER_DIMS[i], LAYER_DIMS[i + 1]
        key, kw, kb = jax.random.split(key, 3)
        bound = 1.0 / jnp.sqrt(jnp.float32(fan_in))
        w = jax.random.uniform(kw, (fan_in, fan_out), jnp.float32, -bound, bound)
        b = jax.random.uniform(kb, (1, fan_out), jnp.float32, -bound, bound)
        params.append((w, b))
    return params


def prepare_params(params):
    """Zero-pad to lane-dense shapes; weights -> bf16, biases stay f32."""
    prepped = []
    for idx, (w, b) in enumerate(params):
        din_p, dout_p = PADDED_DIMS[idx], PADDED_DIMS[idx + 1]
        w_p = jnp.zeros((din_p, dout_p), jnp.float32)
        w_p = w_p.at[:w.shape[0], :w.shape[1]].set(w)
        b_p = jnp.zeros((1, dout_p), jnp.float32)
        b_p = b_p.at[:, :b.shape[1]].set(b)
        prepped.append((w_p.astype(jnp.bfloat16), b_p))
    return prepped


def neural_network_forward(x_nchw, prepped_params, tile_b=128):
    """Equivalent of NeuralNetwork.forward: flatten + linear_relu_stack."""
    batch = x_nchw.shape[0]
    # nn.Flatten(): (B, C, H, W) -> (B, C*H*W)   [glue, stays in plain JAX]
    x = x_nchw.reshape(batch, -1).astype(jnp.float32)
    assert x.shape[1] == LAYER_DIMS[0], \
        f"expected {LAYER_DIMS[0]} features, got {x.shape[1]}"

    # Pad features 784 -> 896 (zeros; W1's padded rows are zero too).
    x = jnp.pad(x, ((0, 0), (0, PADDED_DIMS[0] - LAYER_DIMS[0])))

    # Batch tiling: tile rows fill the MXU for large batches; for tiny batches
    # fall back to a sublane-aligned tile so we don't over-pad.
    tb = min(tile_b, _round_up(batch, 8))
    b_pad = _round_up(batch, tb)
    if b_pad != batch:
        x = jnp.pad(x, ((0, b_pad - batch), (0, 0)))

    flat_params = []
    for w, b in prepped_params:
        flat_params.extend([w, b])

    # Activation/output blocks walk the batch grid; weights/biases use a
    # constant index_map so they stay resident in VMEM across all tiles.
    in_specs = [pl.BlockSpec((tb, PADDED_DIMS[0]), lambda i: (i, 0))]
    for li in range(5):
        din, dout = PADDED_DIMS[li], PADDED_DIMS[li + 1]
        in_specs.append(pl.BlockSpec((din, dout), lambda i: (0, 0)))   # weight
        in_specs.append(pl.BlockSpec((1, dout), lambda i: (0, 0)))     # bias
    out_spec = pl.BlockSpec((tb, PADDED_DIMS[-1]), lambda i: (i, 0))

    out_padded = pl.pallas_call(
        _mlp_kernel,
        out_shape=jax.ShapeDtypeStruct((b_pad, PADDED_DIMS[-1]), jnp.float32),
        grid_spec=pltpu.PrefetchScalarGridSpec(
            num_scalar_prefetch=0,
            grid=(b_pad // tb,),
            in_specs=in_specs,
            out_specs=out_spec,
        ),
        compiler_params=pltpu.CompilerParams(
            dimension_semantics=("parallel",),
        ),
    )(x, *flat_params)

    # Strip batch padding and lane padding of the logits (128 -> 10).
    return out_padded[:batch, :LAYER_DIMS[-1]]


def reference_forward(x_nchw, params):
    """Pure-JAX reference in matching precision (bf16 operands, f32 accumulate)."""
    h = x_nchw.reshape(x_nchw.shape[0], -1).astype(jnp.float32)
    for w, b in params:
        y = jnp.dot(h.astype(jnp.bfloat16), w.astype(jnp.bfloat16),
                    preferred_element_type=jnp.float32) + b
        h = jnp.maximum(y, 0.0)
    return h


if __name__ == "__main__":
    key = jax.random.PRNGKey(0)
    key, kx = jax.random.split(key)

    # Small MNIST-like batch, NCHW: (B=8, C=1, H=28, W=28)
    x = jax.random.normal(kx, (8, 1, 28, 28), dtype=jnp.float32)
    params = init_params(key)
    prepped = prepare_params(params)

    out = neural_network_forward(x, prepped)
    out = jax.block_until_ready(out)

    ref = reference_forward(x, params)
    assert out.shape == (8, 10), out.shape
    assert jnp.allclose(out, ref, atol=1e-2, rtol=1e-2), "mismatch vs reference"

    print("KERNEL_OK")
</pallas_src>

<mosaic_0001>
module attributes {stable_mosaic.version = 11 : i64} {
  func.func @_mlp_kernel(%arg0: i32, %arg1: memref<8x896xf32, #tpu.memory_space<vmem>>, %arg2: memref<896x512xbf16, #tpu.memory_space<vmem>>, %arg3: memref<1x512xf32, #tpu.memory_space<vmem>>, %arg4: memref<512x512xbf16, #tpu.memory_space<vmem>>, %arg5: memref<1x512xf32, #tpu.memory_space<vmem>>, %arg6: memref<512x256xbf16, #tpu.memory_space<vmem>>, %arg7: memref<1x256xf32, #tpu.memory_space<vmem>>, %arg8: memref<256x128xbf16, #tpu.memory_space<vmem>>, %arg9: memref<1x128xf32, #tpu.memory_space<vmem>>, %arg10: memref<128x128xbf16, #tpu.memory_space<vmem>>, %arg11: memref<1x128xf32, #tpu.memory_space<vmem>>, %arg12: memref<8x128xf32, #tpu.memory_space<vmem>>) attributes {dimension_semantics = [#tpu.dimension_semantics<parallel>], iteration_bounds = array<i64: 1>, scalar_prefetch = 0 : i64, scratch_operands = 0 : i64, tpu.core_type = #tpu.core_type<tc>, window_params = [{transform_indices = @transform_0, window_bounds = array<i64: 8, 896>}, {pipeline_mode = #tpu.pipeline_mode<synchronous>, transform_indices = @transform_1, window_bounds = array<i64: 896, 512>}, {pipeline_mode = #tpu.pipeline_mode<synchronous>, transform_indices = @transform_2, window_bounds = array<i64: 1, 512>}, {pipeline_mode = #tpu.pipeline_mode<synchronous>, transform_indices = @transform_3, window_bounds = array<i64: 512, 512>}, {pipeline_mode = #tpu.pipeline_mode<synchronous>, transform_indices = @transform_4, window_bounds = array<i64: 1, 512>}, {pipeline_mode = #tpu.pipeline_mode<synchronous>, transform_indices = @transform_5, window_bounds = array<i64: 512, 256>}, {pipeline_mode = #tpu.pipeline_mode<synchronous>, transform_indices = @transform_6, window_bounds = array<i64: 1, 256>}, {pipeline_mode = #tpu.pipeline_mode<synchronous>, transform_indices = @transform_7, window_bounds = array<i64: 256, 128>}, {pipeline_mode = #tpu.pipeline_mode<synchronous>, transform_indices = @transform_8, window_bounds = array<i64: 1, 128>}, {pipeline_mode = #tpu.pipeline_mode<synchronous>, transform_indices = @transform_9, window_bounds = array<i64: 128, 128>}, {pipeline_mode = #tpu.pipeline_mode<synchronous>, transform_indices = @transform_10, window_bounds = array<i64: 1, 128>}, {transform_indices = @transform_11, window_bounds = array<i64: 8, 128>}]} {
    %c0 = arith.constant 0 : index
    %c0_0 = arith.constant 0 : index
    %0 = vector.load %arg1[%c0, %c0_0] : memref<8x896xf32, #tpu.memory_space<vmem>>, vector<8x896xf32>
    %1 = arith.truncf %0 : vector<8x896xf32> to vector<8x896xbf16>
    %c0_1 = arith.constant 0 : index
    %c0_2 = arith.constant 0 : index
    %2 = vector.load %arg2[%c0_1, %c0_2] : memref<896x512xbf16, #tpu.memory_space<vmem>>, vector<896x512xbf16>
    %cst = arith.constant dense<0.000000e+00> : vector<8x512xf32>
    %3 = tpu.matmul %1, %2, %cst {dimension_numbers = #tpu.dot_dimension_numbers<[1], [0], [0], [1], [0, 0, 1, 1], [], []>} : vector<8x896xbf16>, vector<896x512xbf16>, vector<8x512xf32> -> vector<8x512xf32>
    %c0_3 = arith.constant 0 : index
    %c0_4 = arith.constant 0 : index
    %4 = vector.load %arg3[%c0_3, %c0_4] : memref<1x512xf32, #tpu.memory_space<vmem>>, vector<1x512xf32>
    %5 = vector.broadcast %4 : vector<1x512xf32> to vector<8x512xf32>
    %6 = arith.addf %3, %5 : vector<8x512xf32>
    %cst_5 = arith.constant 0.000000e+00 : f32
    %7 = vector.broadcast %cst_5 : f32 to vector<8x512xf32>
    %8 = arith.maximumf %6, %7 : vector<8x512xf32>
    %9 = arith.truncf %8 : vector<8x512xf32> to vector<8x512xbf16>
    %c0_6 = arith.constant 0 : index
    %c0_7 = arith.constant 0 : index
    %10 = vector.load %arg4[%c0_6, %c0_7] : memref<512x512xbf16, #tpu.memory_space<vmem>>, vector<512x512xbf16>
    %cst_8 = arith.constant dense<0.000000e+00> : vector<8x512xf32>
    %11 = tpu.matmul %9, %10, %cst_8 {dimension_numbers = #tpu.dot_dimension_numbers<[1], [0], [0], [1], [0, 0, 1, 1], [], []>} : vector<8x512xbf16>, vector<512x512xbf16>, vector<8x512xf32> -> vector<8x512xf32>
    %c0_9 = arith.constant 0 : index
    %c0_10 = arith.constant 0 : index
    %12 = vector.load %arg5[%c0_9, %c0_10] : memref<1x512xf32, #tpu.memory_space<vmem>>, vector<1x512xf32>
    %13 = vector.broadcast %12 : vector<1x512xf32> to vector<8x512xf32>
    %14 = arith.addf %11, %13 : vector<8x512xf32>
    %cst_11 = arith.constant 0.000000e+00 : f32
    %15 = vector.broadcast %cst_11 : f32 to vector<8x512xf32>
    %16 = arith.maximumf %14, %15 : vector<8x512xf32>
    %17 = arith.truncf %16 : vector<8x512xf32> to vector<8x512xbf16>
    %c0_12 = arith.constant 0 : index
    %c0_13 = arith.constant 0 : index
    %18 = vector.load %arg6[%c0_12, %c0_13] : memref<512x256xbf16, #tpu.memory_space<vmem>>, vector<512x256xbf16>
    %cst_14 = arith.constant dense<0.000000e+00> : vector<8x256xf32>
    %19 = tpu.matmul %17, %18, %cst_14 {dimension_numbers = #tpu.dot_dimension_numbers<[1], [0], [0], [1], [0, 0, 1, 1], [], []>} : vector<8x512xbf16>, vector<512x256xbf16>, vector<8x256xf32> -> vector<8x256xf32>
    %c0_15 = arith.constant 0 : index
    %c0_16 = arith.constant 0 : index
    %20 = vector.load %arg7[%c0_15, %c0_16] : memref<1x256xf32, #tpu.memory_space<vmem>>, vector<1x256xf32>
    %21 = vector.broadcast %20 : vector<1x256xf32> to vector<8x256xf32>
    %22 = arith.addf %19, %21 : vector<8x256xf32>
    %cst_17 = arith.constant 0.000000e+00 : f32
    %23 = vector.broadcast %cst_17 : f32 to vector<8x256xf32>
    %24 = arith.maximumf %22, %23 : vector<8x256xf32>
    %25 = arith.truncf %24 : vector<8x256xf32> to vector<8x256xbf16>
    %c0_18 = arith.constant 0 : index
    %c0_19 = arith.constant 0 : index
    %26 = vector.load %arg8[%c0_18, %c0_19] : memref<256x128xbf16, #tpu.memory_space<vmem>>, vector<256x128xbf16>
    %cst_20 = arith.constant dense<0.000000e+00> : vector<8x128xf32>
    %27 = tpu.matmul %25, %26, %cst_20 {dimension_numbers = #tpu.dot_dimension_numbers<[1], [0], [0], [1], [0, 0, 1, 1], [], []>} : vector<8x256xbf16>, vector<256x128xbf16>, vector<8x128xf32> -> vector<8x128xf32>
    %c0_21 = arith.constant 0 : index
    %c0_22 = arith.constant 0 : index
    %28 = vector.load %arg9[%c0_21, %c0_22] : memref<1x128xf32, #tpu.memory_space<vmem>>, vector<1x128xf32>
    %29 = vector.broadcast %28 : vector<1x128xf32> to vector<8x128xf32>
    %30 = arith.addf %27, %29 : vector<8x128xf32>
    %cst_23 = arith.constant 0.000000e+00 : f32
    %31 = vector.broadcast %cst_23 : f32 to vector<8x128xf32>
    %32 = arith.maximumf %30, %31 : vector<8x128xf32>
    %33 = arith.truncf %32 : vector<8x128xf32> to vector<8x128xbf16>
    %c0_24 = arith.constant 0 : index
    %c0_25 = arith.constant 0 : index
    %34 = vector.load %arg10[%c0_24, %c0_25] : memref<128x128xbf16, #tpu.memory_space<vmem>>, vector<128x128xbf16>
    %cst_26 = arith.constant dense<0.000000e+00> : vector<8x128xf32>
    %35 = tpu.matmul %33, %34, %cst_26 {dimension_numbers = #tpu.dot_dimension_numbers<[1], [0], [0], [1], [0, 0, 1, 1], [], []>} : vector<8x128xbf16>, vector<128x128xbf16>, vector<8x128xf32> -> vector<8x128xf32>
    %c0_27 = arith.constant 0 : index
    %c0_28 = arith.constant 0 : index
    %36 = vector.load %arg11[%c0_27, %c0_28] : memref<1x128xf32, #tpu.memory_space<vmem>>, vector<1x128xf32>
    %37 = vector.broadcast %36 : vector<1x128xf32> to vector<8x128xf32>
    %38 = arith.addf %35, %37 : vector<8x128xf32>
    %cst_29 = arith.constant 0.000000e+00 : f32
    %39 = vector.broadcast %cst_29 : f32 to vector<8x128xf32>
    %40 = arith.maximumf %38, %39 : vector<8x128xf32>
    %c0_30 = arith.constant 0 : index
    %c0_31 = arith.constant 0 : index
    %41 = vector.load %arg12[%c0_30, %c0_31] : memref<8x128xf32, #tpu.memory_space<vmem>>, vector<8x128xf32>
    tpu.vector_store %arg12[%c0_30, %c0_31], %40 {strides = array<i32>} : memref<8x128xf32, #tpu.memory_space<vmem>>, vector<8x128xf32>,
    return
  }
  func.func @transform_0(%arg0: i32) -> (i32, i32) {
    %c0_i32 = arith.constant 0 : i32
    %c0_i32_0 = arith.constant 0 : i32
    return %arg0, %c0_i32 : i32, i32
  }
  func.func @transform_1(%arg0: i32) -> (i32, i32) {
    %c0_i32 = arith.constant 0 : i32
    %c0_i32_0 = arith.constant 0 : i32
    %c0_i32_1 = arith.constant 0 : i32
    return %c0_i32, %c0_i32_0 : i32, i32
  }
  func.func @transform_2(%arg0: i32) -> (i32, i32) {
    %c0_i32 = arith.constant 0 : i32
    %c0_i32_0 = arith.constant 0 : i32
    %c0_i32_1 = arith.constant 0 : i32
    return %c0_i32, %c0_i32_0 : i32, i32
  }
  func.func @transform_3(%arg0: i32) -> (i32, i32) {
    %c0_i32 = arith.constant 0 : i32
    %c0_i32_0 = arith.constant 0 : i32
    %c0_i32_1 = arith.constant 0 : i32
    return %c0_i32, %c0_i32_0 : i32, i32
  }
  func.func @transform_4(%arg0: i32) -> (i32, i32) {
    %c0_i32 = arith.constant 0 : i32
    %c0_i32_0 = arith.constant 0 : i32
    %c0_i32_1 = arith.constant 0 : i32
    return %c0_i32, %c0_i32_0 : i32, i32
  }
  func.func @transform_5(%arg0: i32) -> (i32, i32) {
    %c0_i32 = arith.constant 0 : i32
    %c0_i32_0 = arith.constant 0 : i32
    %c0_i32_1 = arith.constant 0 : i32
    return %c0_i32, %c0_i32_0 : i32, i32
  }
  func.func @transform_6(%arg0: i32) -> (i32, i32) {
    %c0_i32 = arith.constant 0 : i32
    %c0_i32_0 = arith.constant 0 : i32
    %c0_i32_1 = arith.constant 0 : i32
    return %c0_i32, %c0_i32_0 : i32, i32
  }
  func.func @transform_7(%arg0: i32) -> (i32, i32) {
    %c0_i32 = arith.constant 0 : i32
    %c0_i32_0 = arith.constant 0 : i32
    %c0_i32_1 = arith.constant 0 : i32
    return %c0_i32, %c0_i32_0 : i32, i32
  }
  func.func @transform_8(%arg0: i32) -> (i32, i32) {
    %c0_i32 = arith.constant 0 : i32
    %c0_i32_0 = arith.constant 0 : i32
    %c0_i32_1 = arith.constant 0 : i32
    return %c0_i32, %c0_i32_0 : i32, i32
  }
  func.func @transform_9(%arg0: i32) -> (i32, i32) {
    %c0_i32 = arith.constant 0 : i32
    %c0_i32_0 = arith.constant 0 : i32
    %c0_i32_1 = arith.constant 0 : i32
    return %c0_i32, %c0_i32_0 : i32, i32
  }
  func.func @transform_10(%arg0: i32) -> (i32, i32) {
    %c0_i32 = arith.constant 0 : i32
    %c0_i32_0 = arith.constant 0 : i32
    %c0_i32_1 = arith.constant 0 : i32
    return %c0_i32, %c0_i32_0 : i32, i32
  }
  func.func @transform_11(%arg0: i32) -> (i32, i32) {
    %c0_i32 = arith.constant 0 : i32
    %c0_i32_0 = arith.constant 0 : i32
    return %arg0, %c0_i32 : i32, i32
  }
}

</mosaic_0001>

<bundles_post_ra>
// kernel: tpu_custom_call.1
= control target key start
LH: loop header
LB: loop body
LE: loop exit
PB: predicated region body
PF: predicated region fallthrough
CT: control target
= control target key end

     0   :  { %16 = vsyncpa [#allocation3], 0  ;;  %s5208_s0 = inlined_call_operand.hbm [shape: f32[8,896], index: 0, kind: input, shape index: {}]   ;;  %s5209_s1 = inlined_call_operand.hbm [shape: bf16[896,512], index: 1, kind: input, shape index: {}]   ;;  %s5210_s2 = inlined_call_operand.vmem [shape: f32[1,512], index: 2, kind: input, shape index: {}]   ;;  %s5211_s3 = inlined_call_operand.hbm [shape: bf16[512,512], index: 3, kind: input, shape index: {}]   ;;  %s5212_s4 = inlined_call_operand.vmem [shape: f32[1,512], index: 4, kind: input, shape index: {}]   ;;  %s5213_s5 = inlined_call_operand.hbm [shape: bf16[512,256], index: 5, kind: input, shape index: {}]   ;;  %s5214_s6 = inlined_call_operand.vmem [shape: f32[1,256], index: 6, kind: input, shape index: {}]   ;;  %s5215_s7 = inlined_call_operand.hbm [shape: bf16[256,128], index: 7, kind: input, shape index: {}]   ;;  %s5216_s8 = inlined_call_operand.vmem [shape: f32[1,128], index: 8, kind: input, shape index: {}]   ;;  %s5217_s9 = inlined_call_operand.hbm [shape: bf16[128,128], index: 9, kind: input, shape index: {}]   ;;  %s5218_s10 = inlined_call_operand.vmem [shape: f32[1,128], index: 10, kind: input, shape index: {}]   ;;  %s5219_s11 = inlined_call_operand.hbm [shape: f32[8,128], index: 11, kind: output, shape index: {}]  }
   0x1   :  { %17 = vsyncpa [#allocation6], 0 }
   0x2   :  { %18 = vsyncpa [#allocation9], 0 }
   0x3   :  { %19 = vsyncpa [#allocation12], 0 }
   0x4   :  { %20 = vsyncpa [#allocation4], 0  ;;  %s4953_s17 = smov [#allocation5]   ;;  %s4789_s21 = scalar_lea.hbm %s5209_s1, 28672 }
   0x5   :  { %s36_s18 = sshll.u32 %s4953_s17, 4  ;;  %p4790_p0 = scmp.ne.s32.totalorder %s5209_s1, %s4789_s21  ;;  %s37_s18 = int_to_ptr.vmem [resolvable:$true] %s36_s18 }
   0x6   :  { %p4793_p1 = scmp.lt.u32.totalorder %s4789_s21, %s5209_s1 }
   0x8   :  { %p4795_p2 = pnand %p4793_p1, %p4790_p0 }
   0xa   :  { %4798 = shalt.err (!%p4795_p2)
}
   0xb   :  { %s4799_s26 = scalar_lea.vmem %s37_s18, 28672  ;;  %p4804_p4 = scmp.lt.s32.totalorder %s37_s18, %s37_s18 }
   0xc   :  { %p4800_p3 = scmp.ne.s32.totalorder %s37_s18, %s4799_s26  ;;  %p4805_p5 = scmp.lt.s32.totalorder %s4799_s26, %s4799_s26 }
   0xe   :  { %p4806_p6 = por %p4805_p5, %p4804_p4 }
  0x10   :  { %p4807_p7 = pnand %p4806_p6, %p4800_p3 }
  0x12   :  { %4810 = shalt.err (!%p4807_p7)
}
  0x13   :  { %s4954_s27 = smov 256   ;;  %s4955_s28 = smov 16  }
  0x14   :  { %42 = dma.hbm_to_vmem [thread:$0]  %s5209_s1, 28672, %s37_s18, [#allocation6], %s4954_s27, %s4954_s27, %s4955_s28  }
  0x15   :  { %s4956_s12 = smov [#allocation8]   ;;  %s4811_s16 = scalar_lea.hbm %s5213_s5, 8192 }
  0x16   :  { %s64_s13 = sshll.u32 %s4956_s12, 4  ;;  %p4812_p8 = scmp.ne.s32.totalorder %s5213_s5, %s4811_s16  ;;  %s65_s13 = int_to_ptr.vmem [resolvable:$true] %s64_s13 }
  0x17   :  { %p4815_p9 = scmp.lt.u32.totalorder %s4811_s16, %s5213_s5 }
  0x19   :  { %p4817_p10 = pnand %p4815_p9, %p4812_p8 }
  0x1b   :  { %4820 = shalt.err (!%p4817_p10)
}
  0x1c   :  { %s4821_s22 = scalar_lea.vmem %s65_s13, 8192  ;;  %p4826_p12 = scmp.lt.s32.totalorder %s65_s13, %s65_s13 }
  0x1d   :  { %p4822_p11 = scmp.ne.s32.totalorder %s65_s13, %s4821_s22  ;;  %p4827_p13 = scmp.lt.s32.totalorder %s4821_s22, %s4821_s22 }
  0x1f   :  { %p4828_p0 = por %p4827_p13, %p4826_p12 }
  0x21   :  { %p4829_p1 = pnand %p4828_p0, %p4822_p11 }
  0x23   :  { %4832 = shalt.err (!%p4829_p1)
}
  0x24   :  { %s4957_s1 = smov 128   ;;  %s4958_s18 = smov 8  }
  0x25   :  { %70 = dma.hbm_to_vmem [thread:$0]  %s5213_s5, 8192, %s65_s13, [#allocation9], %s4957_s1, %s4957_s1, %s4958_s18  }
  0x26   :  { %s4959_s25 = smov [#allocation2]   ;;  %s4960_s29 = smov [#allocation7]  }
  0x27   :  { %s27_s26 = sshll.u32 %s4959_s25, 4  ;;  %s50_s30 = sshll.u32 %s4960_s29, 4  ;;  %s28_s26 = int_to_ptr.vmem [resolvable:$true] %s27_s26  ;;  %s5056_s30 = int_to_ptr.vmem [resolvable:$true] %s50_s30 }
  0x28   :  { %s4833_s15 = scalar_lea.hbm %s5208_s0, 896 }
  0x29   :  { %p4834_p2 = scmp.ne.s32.totalorder %s5208_s0, %s4833_s15  ;;  %p4837_p3 = scmp.lt.u32.totalorder %s4833_s15, %s5208_s0 }
  0x2b   :  { %p4839_p4 = pnand %p4837_p3, %p4834_p2 }
  0x2d   :  { %4842 = shalt.err (!%p4839_p4)
}
  0x2e   :  { %s4843_s5 = scalar_lea.vmem %s28_s26, 896  ;;  %p4848_p6 = scmp.lt.s32.totalorder %s28_s26, %s28_s26 }
  0x2f   :  { %p4844_p5 = scmp.ne.s32.totalorder %s28_s26, %s4843_s5  ;;  %p4849_p7 = scmp.lt.s32.totalorder %s4843_s5, %s4843_s5 }
  0x31   :  { %p4850_p8 = por %p4849_p7, %p4848_p6 }
  0x33   :  { %p4851_p9 = pnand %p4850_p8, %p4844_p5 }
  0x35   :  { %4854 = shalt.err (!%p4851_p9)
}
  0x36   :  { %30 = dma.hbm_to_vmem [thread:$0]  %s5208_s0, 896, %s28_s26, [#allocation3]  }
  0x37   :  { %s4855_s18 = scalar_lea.hbm %s5211_s3, 16384 }
  0x38   :  { %p4856_p10 = scmp.ne.s32.totalorder %s5211_s3, %s4855_s18  ;;  %p4859_p11 = scmp.lt.u32.totalorder %s4855_s18, %s5211_s3 }
  0x3a   :  { %p4861_p12 = pnand %p4859_p11, %p4856_p10 }
  0x3c   :  { %4864 = shalt.err (!%p4861_p12)
}
  0x3d   :  { %s4865_s12 = scalar_lea.vmem %s5056_s30, 16384  ;;  %p4870_p0 = scmp.lt.s32.totalorder %s5056_s30, %s5056_s30 }
  0x3e   :  { %p4866_p13 = scmp.ne.s32.totalorder %s5056_s30, %s4865_s12  ;;  %p4871_p1 = scmp.lt.s32.totalorder %s4865_s12, %s4865_s12 }
  0x40   :  { %p4872_p2 = por %p4871_p1, %p4870_p0 }
  0x42   :  { %p4873_p3 = pnand %p4872_p2, %p4866_p13 }
  0x44   :  { %4876 = shalt.err (!%p4873_p3)
}
  0x45   :  { %56 = dma.hbm_to_vmem [thread:$0]  %s5211_s3, 16384, %s5056_s30, [#allocation6], %s4954_s27, %s4954_s27, %s4955_s28  }
  0x46   :  { %s4961_s14 = smov [#allocation10]   ;;  %s4877_s19 = scalar_lea.hbm %s5215_s7, 2048 }
  0x47   :  { %s78_s15 = sshll.u32 %s4961_s14, 4  ;;  %p4878_p4 = scmp.ne.s32.totalorder %s5215_s7, %s4877_s19  ;;  %s79_s15 = int_to_ptr.vmem [resolvable:$true] %s78_s15 }
  0x48   :  { %p4881_p5 = scmp.lt.u32.totalorder %s4877_s19, %s5215_s7 }
  0x4a   :  { %p4883_p6 = pnand %p4881_p5, %p4878_p4 }
  0x4c   :  { %4886 = shalt.err (!%p4883_p6)
}
  0x4d   :  { %s4887_s22 = scalar_lea.vmem %s79_s15, 2048  ;;  %p4892_p8 = scmp.lt.s32.totalorder %s79_s15, %s79_s15 }
  0x4e   :  { %p4888_p7 = scmp.ne.s32.totalorder %s79_s15, %s4887_s22  ;;  %p4893_p9 = scmp.lt.s32.totalorder %s4887_s22, %s4887_s22 }
  0x50   :  { %p4894_p10 = por %p4893_p9, %p4892_p8 }
  0x52   :  { %p4895_p11 = pnand %p4894_p10, %p4888_p7 }
  0x54   :  { %4898 = shalt.err (!%p4895_p11)
}
  0x55   :  { %s4962_s3 = smov 64   ;;  %s4963_s27 = smov 4  }
  0x56   :  { %84 = dma.hbm_to_vmem [thread:$0]  %s5215_s7, 2048, %s79_s15, [#allocation9], %s4962_s3, %s4962_s3, %s4963_s27  }
  0x57   :  { %s4964_s1 = smov [#allocation11]   ;;  %s4899_s25 = scalar_lea.hbm %s5217_s9, 1024 }
  0x58   :  { %s92_s18 = sshll.u32 %s4964_s1, 4  ;;  %p4900_p12 = scmp.ne.s32.totalorder %s5217_s9, %s4899_s25  ;;  %s93_s18 = int_to_ptr.vmem [resolvable:$true] %s92_s18 }
  0x59   :  { %p4903_p13 = scmp.lt.u32.totalorder %s4899_s25, %s5217_s9 }
  0x5b   :  { %p4905_p0 = pnand %p4903_p13, %p4900_p12 }
  0x5d   :  { %4908 = shalt.err (!%p4905_p0)
}
  0x5e   :  { %s4909_s14 = scalar_lea.vmem %s93_s18, 1024  ;;  %p4914_p2 = scmp.lt.s32.totalorder %s93_s18, %s93_s18 }
  0x5f   :  { %p4910_p1 = scmp.ne.s32.totalorder %s93_s18, %s4909_s14  ;;  %p4915_p3 = scmp.lt.s32.totalorder %s4909_s14, %s4909_s14 }
  0x61   :  { %p4916_p4 = por %p4915_p3, %p4914_p2 }
  0x63   :  { %p4917_p5 = pnand %p4916_p4, %p4910_p1 }
  0x65   :  { %4920 = shalt.err (!%p4917_p5)
}
  0x66   :  { %98 = dma.hbm_to_vmem [thread:$0]  %s5217_s9, 1024, %s93_s18, [#allocation12], %s4962_s3, %s4962_s3, %s4963_s27  }
  0x67   :  { %4943 = dma.done.wait [#allocation3], 896  }
  0x68   :  { %4944 = vsyncadd [#allocation3], 4294966400 }
  0x69   :  { %4945 = dma.done.wait [#allocation6], 45056  }
  0x6a   :  { %4946 = vsyncadd [#allocation6], 4294922240 }
  0x6b   :  { %4947 = dma.done.wait [#allocation9], 10240  }
  0x6c   :  { %4948 = vsyncadd [#allocation9], 4294957056 }
  0x6d   :  { %4949 = dma.done.wait [#allocation12], 1024  }
  0x6e   :  { %4950 = vsyncadd [#allocation12], 4294966272  ;;  %v4965_v0 = vmov 0   ;;  %v4141_v1 = vld [vmem:[#allocation5 + $0x4] ss:$16 sps:$4 sm:$0xff]   ;;  %v126_v33 = vld [vmem:[#allocation2 + $0x30] sm:$0xff] }
  0x6f   :  { %1655 = vmatprep.mubr.bf16.mxu1 %v4965_v0  ;;  %v4143_v2 = vld [vmem:[#allocation5 + $0x604] ss:$16 sps:$4 sm:$0xff]   ;;  %1500 = vmatprep.subr.bf16.mxu0 %v4141_v1  ;;  %v4145_v3 = vld [vmem:[#allocation5] ss:$16 sps:$4 sm:$0xff]   ;;  %v4193_v35 = vld [vmem:[#allocation5 + $0xc] ss:$16 sps:$4 sm:$0xff]   ;;  %v5115_v36 = vpack.c.bf16 %v126_v33, %v126_v33 }
  0x70   :  { %v4146_v4 = vld [vmem:[#allocation5 + $0x600] ss:$16 sps:$4 sm:$0xff]   ;;  %1623 = vmatprep.subr.bf16.mxu1 %v4143_v2  ;;  %v4147_v5 = vld [vmem:[#allocation5 + $0x24] ss:$16 sps:$4 sm:$0xff]   ;;  %1501 = vmatpush1.bf16.msra.mxu0 %v4145_v3  ;;  %v4191_v37 = vld [vmem:[#allocation5 + $0x8] ss:$16 sps:$4 sm:$0xff]  }
  0x71   :  { %1624 = vmatpush1.bf16.msra.mxu1 %v4146_v4  ;;  %v4149_v6 = vld [vmem:[#allocation5 + $0x624] ss:$16 sps:$4 sm:$0xff]   ;;  %v4151_v7 = vld [vmem:[#allocation5 + $0x20] ss:$16 sps:$4 sm:$0xff]   ;;  %1502 = vmatprep.subr.bf16.mxu0 %v4147_v5  ;;  %v4199_v40 = vld [vmem:[#allocation5 + $0x2c] ss:$16 sps:$4 sm:$0xff]  }
  0x72   :  { %v4152_v8 = vld [vmem:[#allocation5 + $0x620] ss:$16 sps:$4 sm:$0xff]   ;;  %1625 = vmatprep.subr.bf16.mxu1 %v4149_v6  ;;  %v4153_v9 = vld [vmem:[#allocation5 + $0x44] ss:$16 sps:$4 sm:$0xff]   ;;  %v4197_v41 = vld [vmem:[#allocation5 + $0x28] ss:$16 sps:$4 sm:$0xff]  }
  0x73   :  { %v4155_v10 = vld [vmem:[#allocation5 + $0x644] ss:$16 sps:$4 sm:$0xff]   ;;  %v4157_v11 = vld [vmem:[#allocation5 + $0x40] ss:$16 sps:$4 sm:$0xff]   ;;  %v4205_v44 = vld [vmem:[#allocation5 + $0x4c] ss:$16 sps:$4 sm:$0xff]  }
  0x74   :  { %v4158_v12 = vld [vmem:[#allocation5 + $0x640] ss:$16 sps:$4 sm:$0xff]   ;;  %1503 = vmatpush1.bf16.msra.mxu0 %v4151_v7  ;;  %v4159_v13 = vld [vmem:[#allocation5 + $0x64] ss:$16 sps:$4 sm:$0xff]   ;;  %v4203_v45 = vld [vmem:[#allocation5 + $0x48] ss:$16 sps:$4 sm:$0xff]  }
  0x75   :  { %1626 = vmatpush1.bf16.msra.mxu1 %v4152_v8  ;;  %1504 = vmatprep.subr.bf16.mxu0 %v4153_v9  ;;  %v4161_v14 = vld [vmem:[#allocation5 + $0x664] ss:$16 sps:$4 sm:$0xff]   ;;  %v4163_v15 = vld [vmem:[#allocation5 + $0x60] ss:$16 sps:$4 sm:$0xff]   ;;  %v4211_v48 = vld [vmem:[#allocation5 + $0x6c] ss:$16 sps:$4 sm:$0xff]  }
  0x76   :  { %1627 = vmatprep.subr.bf16.mxu1 %v4155_v10  ;;  %v4164_v16 = vld [vmem:[#allocation5 + $0x660] ss:$16 sps:$4 sm:$0xff]   ;;  %v4165_v17 = vld [vmem:[#allocation5 + $0x84] ss:$16 sps:$4 sm:$0xff]   ;;  %v4209_v50 = vld [vmem:[#allocation5 + $0x68] ss:$16 sps:$4 sm:$0xff]  }
  0x77   :  { %v4167_v18 = vld [vmem:[#allocation5 + $0x684] ss:$16 sps:$4 sm:$0xff]   ;;  %v4169_v19 = vld [vmem:[#allocation5 + $0x80] ss:$16 sps:$4 sm:$0xff]   ;;  %v4217_v54 = vld [vmem:[#allocation5 + $0x8c] ss:$16 sps:$4 sm:$0xff]  }
  0x78   :  { %1505 = vmatpush1.bf16.msra.mxu0 %v4157_v11  ;;  %v4170_v20 = vld [vmem:[#allocation5 + $0x680] ss:$16 sps:$4 sm:$0xff]   ;;  %v4171_v21 = vld [vmem:[#allocation5 + $0xa4] ss:$16 sps:$4 sm:$0xff]   ;;  %v4215_v55 = vld [vmem:[#allocation5 + $0x88] ss:$16 sps:$4 sm:$0xff]  }
  0x79   :  { %1628 = vmatpush1.bf16.msra.mxu1 %v4158_v12  ;;  %1506 = vmatprep.subr.bf16.mxu0 %v4159_v13  ;;  %v4173_v22 = vld [vmem:[#allocation5 + $0x6a4] ss:$16 sps:$4 sm:$0xff]   ;;  %v4175_v23 = vld [vmem:[#allocation5 + $0xa0] ss:$16 sps:$4 sm:$0xff]   ;;  %v4223_v58 = vld [vmem:[#allocation5 + $0xac] ss:$16 sps:$4 sm:$0xff]  }
  0x7a   :  { %1629 = vmatprep.subr.bf16.mxu1 %v4161_v14  ;;  %v4176_v24 = vld [vmem:[#allocation5 + $0x6a0] ss:$16 sps:$4 sm:$0xff]   ;;  %v4177_v25 = vld [vmem:[#allocation5 + $0xc4] ss:$16 sps:$4 sm:$0xff]   ;;  %v4221_v59 = vld [vmem:[#allocation5 + $0xa8] ss:$16 sps:$4 sm:$0xff]  }
  0x7b   :  { %v4179_v26 = vld [vmem:[#allocation5 + $0x6c4] ss:$16 sps:$4 sm:$0xff]   ;;  %v4181_v27 = vld [vmem:[#allocation5 + $0xc0] ss:$16 sps:$4 sm:$0xff]   ;;  %v4229_v62 = vld [vmem:[#allocation5 + $0xcc] ss:$16 sps:$4 sm:$0xff]  }
  0x7c   :  { %1507 = vmatpush1.bf16.msra.mxu0 %v4163_v15  ;;  %v4182_v28 = vld [vmem:[#allocation5 + $0x6c0] ss:$16 sps:$4 sm:$0xff]   ;;  %v4183_v29 = vld [vmem:[#allocation5 + $0xe4] ss:$16 sps:$4 sm:$0xff]   ;;  %v4227_v63 = vld [vmem:[#allocation5 + $0xc8] ss:$16 sps:$4 sm:$0xff]  }
  0x7d   :  { %1630 = vmatpush1.bf16.msra.mxu1 %v4164_v16  ;;  %1508 = vmatprep.subr.bf16.mxu0 %v4165_v17  ;;  %v4185_v30 = vld [vmem:[#allocation5 + $0x6e4] ss:$16 sps:$4 sm:$0xff]   ;;  %v4187_v31 = vld [vmem:[#allocation5 + $0xe0] ss:$16 sps:$4 sm:$0xff]   ;;  %v4235_v3 = vld [vmem:[#allocation5 + $0xec] ss:$16 sps:$4 sm:$0xff]  }
  0x7e   :  { %1631 = vmatprep.subr.bf16.mxu1 %v4167_v18  ;;  %v4188_v32 = vld [vmem:[#allocation5 + $0x6e0] ss:$16 sps:$4 sm:$0xff]   ;;  %v4189_v34 = vld [vmem:[#allocation5 + $0x104] ss:$16 sps:$4 sm:$0xff]   ;;  %v4233_v4 = vld [vmem:[#allocation5 + $0xe8] ss:$16 sps:$4 sm:$0xff]  }
  0x7f   :  { %v4194_v38 = vld [vmem:[#allocation5 + $0x100] ss:$16 sps:$4 sm:$0xff]   ;;  %v4195_v39 = vld [vmem:[#allocation5 + $0x124] ss:$16 sps:$4 sm:$0xff]   ;;  %v120_v7 = vld [vmem:[#allocation2] sm:$0xff]  ;;  %vm4967_vm0 = vmmov 0  }
  0x80   :  { %1509 = vmatpush1.bf16.msra.mxu0 %v4169_v19  ;;  %v4200_v42 = vld [vmem:[#allocation5 + $0x120] ss:$16 sps:$4 sm:$0xff]   ;;  %v4201_v43 = vld [vmem:[#allocation5 + $0x144] ss:$16 sps:$4 sm:$0xff]   ;;  %v4242_v8 = vld [vmem:[#allocation5 + $0x10c] ss:$16 sps:$4 sm:$0xff]   ;;  %v5118_v10 = vpack.c.bf16 %v120_v7, %v120_v7 }
  0x81   :  { %1632 = vmatpush1.bf16.msra.mxu1 %v4170_v20  ;;  %1510 = vmatprep.subr.bf16.mxu0 %v4171_v21  ;;  %v4206_v46 = vld [vmem:[#allocation5 + $0x140] ss:$16 sps:$4 sm:$0xff]   ;;  %v4207_v47 = vld [vmem:[#allocation5 + $0x164] ss:$16 sps:$4 sm:$0xff]   ;;  %v4240_v11 = vld [vmem:[#allocation5 + $0x108] ss:$16 sps:$4 sm:$0xff]  }
  0x82   :  { %1633 = vmatprep.subr.bf16.mxu1 %v4173_v22  ;;  %v121_v49 = vld [vmem:[#allocation2 + $0x8] sm:$0xff]  ;;  %v4248_v13 = vld [vmem:[#allocation5 + $0x12c] ss:$16 sps:$4 sm:$0xff]   ;;  %v4246_v15 = vld [vmem:[#allocation5 + $0x128] ss:$16 sps:$4 sm:$0xff]   ;;  %s4968_s21 = smov [#allocation13]  }
  0x83   :  { %v4212_v51 = vld [vmem:[#allocation5 + $0x160] ss:$16 sps:$4 sm:$0xff]   ;;  %v128_v52 = vpack.c.bf16 %v121_v49, %v121_v49  ;;  %v4213_v53 = vld [vmem:[#allocation5 + $0x184] ss:$16 sps:$4 sm:$0xff]   ;;  %v4254_v17 = vld [vmem:[#allocation5 + $0x14c] ss:$16 sps:$4 sm:$0xff]  }
  0x84   :  { %1511 = vmatpush1.bf16.msra.mxu0 %v4175_v23  ;;  %v4218_v56 = vld [vmem:[#allocation5 + $0x180] ss:$16 sps:$4 sm:$0xff]   ;;  %v4219_v57 = vld [vmem:[#allocation5 + $0x1a4] ss:$16 sps:$4 sm:$0xff]   ;;  %v4252_v19 = vld [vmem:[#allocation5 + $0x148] ss:$16 sps:$4 sm:$0xff]  }
  0x85   :  { %1634 = vmatpush1.bf16.msra.mxu1 %v4176_v24  ;;  %1512 = vmatprep.subr.bf16.mxu0 %v4177_v25  ;;  %v4224_v60 = vld [vmem:[#allocation5 + $0x1a0] ss:$16 sps:$4 sm:$0xff]   ;;  %v4225_v61 = vld [vmem:[#allocation5 + $0x1c4] ss:$16 sps:$4 sm:$0xff]   ;;  %v4260_v21 = vld [vmem:[#allocation5 + $0x16c] ss:$16 sps:$4 sm:$0xff]  }
  0x86   :  { %1635 = vmatprep.subr.bf16.mxu1 %v4179_v26  ;;  %1532 = vmatprep.mubr.bf16.mxu0 %v128_v52  ;;  %v4230_v1 = vld [vmem:[#allocation5 + $0x1c0] ss:$16 sps:$4 sm:$0xff]   ;;  %v4231_v2 = vld [vmem:[#allocation5 + $0x1e4] ss:$16 sps:$4 sm:$0xff]   ;;  %v4258_v23 = vld [vmem:[#allocation5 + $0x168] ss:$16 sps:$4 sm:$0xff]  }
  0x87   :  { %v4236_v5 = vld [vmem:[#allocation5 + $0x1e0] ss:$16 sps:$4 sm:$0xff]   ;;  %v4239_v6 = vld [vmem:[#allocation5 + $0x204] ss:$16 sps:$4 sm:$0xff]   ;;  %v4266_v25 = vld [vmem:[#allocation5 + $0x18c] ss:$16 sps:$4 sm:$0xff]  }
  0x88   :  { %1513 = vmatpush1.bf16.msra.mxu0 %v4181_v27  ;;  %v4237_v9 = vld [vmem:[#allocation5 + $0x200] ss:$16 sps:$4 sm:$0xff]   ;;  %v4245_v12 = vld [vmem:[#allocation5 + $0x224] ss:$16 sps:$4 sm:$0xff]   ;;  %v4264_v27 = vld [vmem:[#allocation5 + $0x188] ss:$16 sps:$4 sm:$0xff]  }
  0x89   :  { %1636 = vmatpush1.bf16.msra.mxu1 %v4182_v28  ;;  %1514 = vmatprep.subr.bf16.mxu0 %v4183_v29  ;;  %v4243_v14 = vld [vmem:[#allocation5 + $0x220] ss:$16 sps:$4 sm:$0xff]   ;;  %v4251_v16 = vld [vmem:[#allocation5 + $0x244] ss:$16 sps:$4 sm:$0xff]   ;;  %v4272_v29 = vld [vmem:[#allocation5 + $0x1ac] ss:$16 sps:$4 sm:$0xff]  }
  0x8a   :  { %1637 = vmatprep.subr.bf16.mxu1 %v4185_v30  ;;  %v4249_v18 = vld [vmem:[#allocation5 + $0x240] ss:$16 sps:$4 sm:$0xff]   ;;  %v4257_v20 = vld [vmem:[#allocation5 + $0x264] ss:$16 sps:$4 sm:$0xff]   ;;  %v4278_v33 = vld [vmem:[#allocation5 + $0x1cc] ss:$16 sps:$4 sm:$0xff]  }
  0x8b   :  { %v4255_v22 = vld [vmem:[#allocation5 + $0x260] ss:$16 sps:$4 sm:$0xff]   ;;  %v4263_v24 = vld [vmem:[#allocation5 + $0x284] ss:$16 sps:$4 sm:$0xff]   ;;  %v4324_v7 = vld [vmem:[#allocation5 + $0x2c8] ss:$16 sps:$4 sm:$0xff]  }
  0x8c   :  { %1515 = vmatpush1.bf16.msra.mxu0 %v4187_v31  ;;  %v4261_v26 = vld [vmem:[#allocation5 + $0x280] ss:$16 sps:$4 sm:$0xff]   ;;  %v4269_v28 = vld [vmem:[#allocation5 + $0x2a4] ss:$16 sps:$4 sm:$0xff]   ;;  %v4270_v31 = vld [vmem:[#allocation5 + $0x1a8] ss:$16 sps:$4 sm:$0xff]  }
  0x8d   :  { %1638 = vmatpush1.bf16.msra.mxu1 %v4188_v32  ;;  %1516 = vmatprep.subr.bf16.mxu0 %v4189_v34  ;;  %v4267_v30 = vld [vmem:[#allocation5 + $0x2a0] ss:$16 sps:$4 sm:$0xff]   ;;  %v4275_v32 = vld [vmem:[#allocation5 + $0x2c4] ss:$16 sps:$4 sm:$0xff]   ;;  %s3576_s22 = sshll.u32 %s4968_s21, 4  ;;  %s3577_s22 = int_to_ptr.vmem [resolvable:$true] %s3576_s22 }
  0x8e   :  { %1664 = vmatprep.subr.bf16.mxu1 %v4193_v35  ;;  %v123_v34 = vld [vmem:[#allocation2 + $0x18] sm:$0xff]  ;;  %p4926_p7 = scmp.lt.s32.totalorder %s3577_s22, %s3577_s22 }
  0x8f   :  { %v4273_v35 = vld [vmem:[#allocation5 + $0x2c0] ss:$16 sps:$4 sm:$0xff]  }
  0x90   :  { %1656 = vmatmul.mubr.bf16.vlgmr.msra.gmra.mrb[0].mxu1 %v5115_v36  ;;  %1517 = vmatpush1.bf16.msra.mxu0 %v4194_v38  ;;  %v4276_v38 = vld [vmem:[#allocation5 + $0x1c8] ss:$16 sps:$4 sm:$0xff]   ;;  %v4291_v49 = vld [vmem:[#allocation5 + $0x320] ss:$16 sps:$4 sm:$0xff]  }
  0x91   :  { %1665 = vmatpush1.bf16.msra.mxu1 %v4191_v37  ;;  %1518 = vmatprep.subr.bf16.mxu0 %v4195_v39  ;;  %v130_v37 = vpack.c.bf16 %v123_v34, %v123_v34  ;;  %v4281_v39 = vld [vmem:[#allocation5 + $0x2e4] ss:$16 sps:$4 sm:$0xff]   ;;  %v4357_v34 = vld [vmem:[#allocation5 + $0x480] ss:$16 sps:$4 sm:$0xff]  }
  0x92   :  { %1666 = vmatprep.subr.bf16.mxu1 %v4199_v40  ;;  %1696 = vmatprep.mubr.bf16.mxu1 %v128_v52  ;;  %v4284_v40 = vld [vmem:[#allocation5 + $0x1ec] ss:$16 sps:$4 sm:$0xff]  }
  0x93   :  { %v4302_v52 = vld [vmem:[#allocation5 + $0x24c] ss:$16 sps:$4 sm:$0xff]  }
  0x94   :  { %1519 = vmatpush1.bf16.msra.mxu0 %v4200_v42  ;;  %v4282_v42 = vld [vmem:[#allocation5 + $0x1e8] ss:$16 sps:$4 sm:$0xff]  }
  0x95   :  { %1667 = vmatpush1.bf16.msra.mxu1 %v4197_v41  ;;  %1520 = vmatprep.subr.bf16.mxu0 %v4201_v43  ;;  %v4279_v41 = vld [vmem:[#allocation5 + $0x2e0] ss:$16 sps:$4 sm:$0xff]   ;;  %v4287_v43 = vld [vmem:[#allocation5 + $0x304] ss:$16 sps:$4 sm:$0xff]  }
  0x96   :  { %1668 = vmatprep.subr.bf16.mxu1 %v4205_v44  ;;  %v4290_v44 = vld [vmem:[#allocation5 + $0x20c] ss:$16 sps:$4 sm:$0xff]  }
  0x98   :  { %1521 = vmatpush1.bf16.msra.mxu0 %v4206_v46  ;;  %v4288_v46 = vld [vmem:[#allocation5 + $0x208] ss:$16 sps:$4 sm:$0xff]  }
  0x99   :  { %1669 = vmatpush1.bf16.msra.mxu1 %v4203_v45  ;;  %1522 = vmatprep.subr.bf16.mxu0 %v4207_v47  ;;  %v4285_v45 = vld [vmem:[#allocation5 + $0x300] ss:$16 sps:$4 sm:$0xff]   ;;  %v4293_v47 = vld [vmem:[#allocation5 + $0x324] ss:$16 sps:$4 sm:$0xff]  }
  0x9a   :  { %1670 = vmatprep.subr.bf16.mxu1 %v4211_v48  ;;  %v4296_v48 = vld [vmem:[#allocation5 + $0x22c] ss:$16 sps:$4 sm:$0xff]  }
  0x9c   :  { %1523 = vmatpush1.bf16.msra.mxu0 %v4212_v51  ;;  %v4299_v51 = vld [vmem:[#allocation5 + $0x344] ss:$16 sps:$4 sm:$0xff]  }
  0x9d   :  { %1671 = vmatpush1.bf16.msra.mxu1 %v4209_v50  ;;  %1524 = vmatprep.subr.bf16.mxu0 %v4213_v53  ;;  %v4294_v50 = vld [vmem:[#allocation5 + $0x228] ss:$16 sps:$4 sm:$0xff]   ;;  %v4297_v53 = vld [vmem:[#allocation5 + $0x340] ss:$16 sps:$4 sm:$0xff]  }
  0x9e   :  { %1672 = vmatprep.subr.bf16.mxu1 %v4217_v54  ;;  %v4300_v54 = vld [vmem:[#allocation5 + $0x248] ss:$16 sps:$4 sm:$0xff]  }
  0xa0   :  { %1525 = vmatpush1.bf16.msra.mxu0 %v4218_v56  ;;  %v4308_v56 = vld [vmem:[#allocation5 + $0x26c] ss:$16 sps:$4 sm:$0xff]  }
  0xa1   :  { %1673 = vmatpush1.bf16.msra.mxu1 %v4215_v55  ;;  %1526 = vmatprep.subr.bf16.mxu0 %v4219_v57  ;;  %v4305_v55 = vld [vmem:[#allocation5 + $0x364] ss:$16 sps:$4 sm:$0xff]   ;;  %v4303_v57 = vld [vmem:[#allocation5 + $0x360] ss:$16 sps:$4 sm:$0xff]  }
  0xa2   :  { %1674 = vmatprep.subr.bf16.mxu1 %v4223_v58  ;;  %v4306_v58 = vld [vmem:[#allocation5 + $0x268] ss:$16 sps:$4 sm:$0xff]  }
  0xa4   :  { %1527 = vmatpush1.bf16.msra.mxu0 %v4224_v60  ;;  %v4314_v60 = vld [vmem:[#allocation5 + $0x28c] ss:$16 sps:$4 sm:$0xff]  }
  0xa5   :  { %1675 = vmatpush1.bf16.msra.mxu1 %v4221_v59  ;;  %1528 = vmatprep.subr.bf16.mxu0 %v4225_v61  ;;  %v4311_v59 = vld [vmem:[#allocation5 + $0x384] ss:$16 sps:$4 sm:$0xff]   ;;  %v4309_v61 = vld [vmem:[#allocation5 + $0x380] ss:$16 sps:$4 sm:$0xff]  }
  0xa6   :  { %1676 = vmatprep.subr.bf16.mxu1 %v4229_v62  ;;  %v4312_v62 = vld [vmem:[#allocation5 + $0x288] ss:$16 sps:$4 sm:$0xff]  }
  0xa8   :  { %1529 = vmatpush1.bf16.msra.mxu0 %v4230_v1  ;;  %v4320_v1 = vld [vmem:[#allocation5 + $0x2ac] ss:$16 sps:$4 sm:$0xff]  }
  0xa9   :  { %1677 = vmatpush1.bf16.msra.mxu1 %v4227_v63  ;;  %1530 = vmatprep.subr.bf16.mxu0 %v4231_v2  ;;  %v4317_v63 = vld [vmem:[#allocation5 + $0x3a4] ss:$16 sps:$4 sm:$0xff]   ;;  %v4315_v2 = vld [vmem:[#allocation5 + $0x3a0] ss:$16 sps:$4 sm:$0xff]  }
  0xaa   :  { %1678 = vmatprep.subr.bf16.mxu1 %v4235_v3  ;;  %v4318_v3 = vld [vmem:[#allocation5 + $0x2a8] ss:$16 sps:$4 sm:$0xff]  }
  0xac   :  { %1531 = vmatpush1.bf16.msra.mxu0 %v4236_v5  ;;  %v4326_v5 = vld [vmem:[#allocation5 + $0x2cc] ss:$16 sps:$4 sm:$0xff]  }
  0xad   :  { %1679 = vmatpush1.bf16.msra.mxu1 %v4233_v4  ;;  %1541 = vmatprep.subr.bf16.mxu0 %v4239_v6  ;;  %v4323_v4 = vld [vmem:[#allocation5 + $0x3c4] ss:$16 sps:$4 sm:$0xff]   ;;  %v4321_v6 = vld [vmem:[#allocation5 + $0x3c0] ss:$16 sps:$4 sm:$0xff]  }
  0xae   :  { %1680 = vmatprep.subr.bf16.mxu1 %v4242_v8  ;;  %v4329_v8 = vld [vmem:[#allocation5 + $0x3e4] ss:$16 sps:$4 sm:$0xff]  }
  0xaf   :  { %1533 = vmatmul.mubr.bf16.vlgmr.msra.gmra.mrb[0].mxu0 %v5118_v10 }
  0xb0   :  { %1542 = vmatpush1.bf16.msra.mxu0 %v4237_v9  ;;  %1573 = vmatprep.mubr.bf16.mxu0 %v130_v37  ;;  %v4332_v9 = vld [vmem:[#allocation5 + $0x2ec] ss:$16 sps:$4 sm:$0xff]  }
  0xb1   :  { %1681 = vmatpush1.bf16.msra.mxu1 %v4240_v11  ;;  %1543 = vmatprep.subr.bf16.mxu0 %v4245_v12  ;;  %v4330_v11 = vld [vmem:[#allocation5 + $0x2e8] ss:$16 sps:$4 sm:$0xff]  }
  0xb2   :  { %1682 = vmatprep.subr.bf16.mxu1 %v4248_v13  ;;  %v122_v12 = vld [vmem:[#allocation2 + $0x10] sm:$0xff]  ;;  %v4335_v13 = vld [vmem:[#allocation5 + $0x404] ss:$16 sps:$4 sm:$0xff]  }
  0xb4   :  { %1544 = vmatpush1.bf16.msra.mxu0 %v4243_v14  ;;  %v4338_v14 = vld [vmem:[#allocation5 + $0x30c] ss:$16 sps:$4 sm:$0xff]  }
  0xb5   :  { %1683 = vmatpush1.bf16.msra.mxu1 %v4246_v15  ;;  %1545 = vmatprep.subr.bf16.mxu0 %v4251_v16  ;;  %v4333_v15 = vld [vmem:[#allocation5 + $0x400] ss:$16 sps:$4 sm:$0xff]   ;;  %v5122_v16 = vpack.c.bf16 %v122_v12, %v122_v12 }
  0xb6   :  { %1684 = vmatprep.subr.bf16.mxu1 %v4254_v17  ;;  %v4336_v17 = vld [vmem:[#allocation5 + $0x308] ss:$16 sps:$4 sm:$0xff]   ;;  %v4417_v12 = vld [vmem:[#allocation5 + $0x5c0] ss:$16 sps:$4 sm:$0xff]  }
  0xb8   :  { %1546 = vmatpush1.bf16.msra.mxu0 %v4249_v18  ;;  %v4341_v18 = vld [vmem:[#allocation5 + $0x424] ss:$16 sps:$4 sm:$0xff]  }
  0xb9   :  { %1685 = vmatpush1.bf16.msra.mxu1 %v4252_v19  ;;  %1547 = vmatprep.subr.bf16.mxu0 %v4257_v20  ;;  %v4344_v19 = vld [vmem:[#allocation5 + $0x32c] ss:$16 sps:$4 sm:$0xff]   ;;  %v125_v20 = vld [vmem:[#allocation2 + $0x28] sm:$0xff] }
  0xba   :  { %1686 = vmatprep.subr.bf16.mxu1 %v4260_v21  ;;  %v5124_v21 = vpack.c.bf16 %v125_v20, %v125_v20  ;;  %v4479_v20 = vld [vmem:[#allocation7 + $0x4] ss:$16 sps:$4 sm:$0xff]  }
  0xbc   :  { %1548 = vmatpush1.bf16.msra.mxu0 %v4255_v22  ;;  %v4339_v22 = vld [vmem:[#allocation5 + $0x420] ss:$16 sps:$4 sm:$0xff]  }
  0xbd   :  { %1687 = vmatpush1.bf16.msra.mxu1 %v4258_v23  ;;  %1549 = vmatprep.subr.bf16.mxu0 %v4263_v24  ;;  %v4342_v23 = vld [vmem:[#allocation5 + $0x328] ss:$16 sps:$4 sm:$0xff]   ;;  %v4347_v24 = vld [vmem:[#allocation5 + $0x444] ss:$16 sps:$4 sm:$0xff]  }
  0xbe   :  { %1688 = vmatprep.subr.bf16.mxu1 %v4266_v25  ;;  %v4350_v25 = vld [vmem:[#allocation5 + $0x34c] ss:$16 sps:$4 sm:$0xff]  }
  0xc0   :  { %1550 = vmatpush1.bf16.msra.mxu0 %v4261_v26  ;;  %v4345_v26 = vld [vmem:[#allocation5 + $0x440] ss:$16 sps:$4 sm:$0xff]  }
  0xc1   :  { %1689 = vmatpush1.bf16.msra.mxu1 %v4264_v27  ;;  %1551 = vmatprep.subr.bf16.mxu0 %v4269_v28  ;;  %v4348_v27 = vld [vmem:[#allocation5 + $0x348] ss:$16 sps:$4 sm:$0xff]   ;;  %v4353_v28 = vld [vmem:[#allocation5 + $0x464] ss:$16 sps:$4 sm:$0xff]  }
  0xc2   :  { %1690 = vmatprep.subr.bf16.mxu1 %v4272_v29  ;;  %v4356_v29 = vld [vmem:[#allocation5 + $0x36c] ss:$16 sps:$4 sm:$0xff]  }
  0xc4   :  { %1552 = vmatpush1.bf16.msra.mxu0 %v4267_v30  ;;  %v4351_v30 = vld [vmem:[#allocation5 + $0x460] ss:$16 sps:$4 sm:$0xff]  }
  0xc5   :  { %1691 = vmatpush1.bf16.msra.mxu1 %v4270_v31  ;;  %1553 = vmatprep.subr.bf16.mxu0 %v4275_v32  ;;  %v4354_v31 = vld [vmem:[#allocation5 + $0x368] ss:$16 sps:$4 sm:$0xff]   ;;  %v4359_v32 = vld [vmem:[#allocation5 + $0x484] ss:$16 sps:$4 sm:$0xff]  }
  0xc6   :  { %1692 = vmatprep.subr.bf16.mxu1 %v4278_v33  ;;  %v4362_v33 = vld [vmem:[#allocation5 + $0x38c] ss:$16 sps:$4 sm:$0xff]  }
  0xc8   :  { %1554 = vmatpush1.bf16.msra.mxu0 %v4273_v35  ;;  %v4360_v35 = vld [vmem:[#allocation5 + $0x388] ss:$16 sps:$4 sm:$0xff]  }
  0xc9   :  { %1693 = vmatpush1.bf16.msra.mxu1 %v4276_v38  ;;  %1555 = vmatprep.subr.bf16.mxu0 %v4281_v39  ;;  %v4368_v38 = vld [vmem:[#allocation5 + $0x3ac] ss:$16 sps:$4 sm:$0xff]   ;;  %v4363_v39 = vld [vmem:[#allocation5 + $0x4a0] ss:$16 sps:$4 sm:$0xff]  }
  0xca   :  { %1694 = vmatprep.subr.bf16.mxu1 %v4284_v40  ;;  %v4366_v40 = vld [vmem:[#allocation5 + $0x3a8] ss:$16 sps:$4 sm:$0xff]  }
  0xcc   :  { %1556 = vmatpush1.bf16.msra.mxu0 %v4279_v41  ;;  %v4371_v41 = vld [vmem:[#allocation5 + $0x4c4] ss:$16 sps:$4 sm:$0xff]  }
  0xcd   :  { %1695 = vmatpush1.bf16.msra.mxu1 %v4282_v42  ;;  %1557 = vmatprep.subr.bf16.mxu0 %v4287_v43  ;;  %v4374_v42 = vld [vmem:[#allocation5 + $0x3cc] ss:$16 sps:$4 sm:$0xff]   ;;  %v4369_v43 = vld [vmem:[#allocation5 + $0x4c0] ss:$16 sps:$4 sm:$0xff]  }
  0xce   :  { %1705 = vmatprep.subr.bf16.mxu1 %v4290_v44  ;;  %v4372_v44 = vld [vmem:[#allocation5 + $0x3c8] ss:$16 sps:$4 sm:$0xff]  }
  0xd0   :  { %1697 = vmatmul.mubr.bf16.vlgmr.msra.gmra.mrb[4].mxu1 %v5118_v10  ;;  %1558 = vmatpush1.bf16.msra.mxu0 %v4285_v45  ;;  %v4327_v10 = vld [vmem:[#allocation5 + $0x3e0] ss:$16 sps:$4 sm:$0xff]   ;;  %v4377_v45 = vld [vmem:[#allocation5 + $0x4e4] ss:$16 sps:$4 sm:$0xff]  }
  0xd1   :  { %1706 = vmatpush1.bf16.msra.mxu1 %v4288_v46  ;;  %1559 = vmatprep.subr.bf16.mxu0 %v4293_v47  ;;  %v4380_v46 = vld [vmem:[#allocation5 + $0x3ec] ss:$16 sps:$4 sm:$0xff]   ;;  %v4375_v47 = vld [vmem:[#allocation5 + $0x4e0] ss:$16 sps:$4 sm:$0xff]  }
  0xd2   :  { %1707 = vmatprep.subr.bf16.mxu1 %v4296_v48  ;;  %1737 = vmatprep.mubr.bf16.mxu1 %v130_v37  ;;  %v4365_v37 = vld [vmem:[#allocation5 + $0x4a4] ss:$16 sps:$4 sm:$0xff]   ;;  %v4378_v48 = vld [vmem:[#allocation5 + $0x3e8] ss:$16 sps:$4 sm:$0xff]  }
  0xd4   :  { %1560 = vmatpush1.bf16.msra.mxu0 %v4291_v49  ;;  %v4383_v49 = vld [vmem:[#allocation5 + $0x504] ss:$16 sps:$4 sm:$0xff]  }
  0xd5   :  { %1708 = vmatpush1.bf16.msra.mxu1 %v4294_v50  ;;  %1561 = vmatprep.subr.bf16.mxu0 %v4299_v51  ;;  %v4386_v50 = vld [vmem:[#allocation5 + $0x40c] ss:$16 sps:$4 sm:$0xff]   ;;  %v4381_v51 = vld [vmem:[#allocation5 + $0x500] ss:$16 sps:$4 sm:$0xff]  }
  0xd6   :  { %1709 = vmatprep.subr.bf16.mxu1 %v4302_v52  ;;  %v4384_v52 = vld [vmem:[#allocation5 + $0x408] ss:$16 sps:$4 sm:$0xff]  }
  0xd8   :  { %1562 = vmatpush1.bf16.msra.mxu0 %v4297_v53  ;;  %v4389_v53 = vld [vmem:[#allocation5 + $0x524] ss:$16 sps:$4 sm:$0xff]  }
  0xd9   :  { %1710 = vmatpush1.bf16.msra.mxu1 %v4300_v54  ;;  %1563 = vmatprep.subr.bf16.mxu0 %v4305_v55  ;;  %v4392_v54 = vld [vmem:[#allocation5 + $0x42c] ss:$16 sps:$4 sm:$0xff]   ;;  %v4387_v55 = vld [vmem:[#allocation5 + $0x520] ss:$16 sps:$4 sm:$0xff]  }
  0xda   :  { %1711 = vmatprep.subr.bf16.mxu1 %v4308_v56  ;;  %v4390_v56 = vld [vmem:[#allocation5 + $0x428] ss:$16 sps:$4 sm:$0xff]  }
  0xdc   :  { %1564 = vmatpush1.bf16.msra.mxu0 %v4303_v57  ;;  %v4395_v57 = vld [vmem:[#allocation5 + $0x544] ss:$16 sps:$4 sm:$0xff]  }
  0xdd   :  { %1712 = vmatpush1.bf16.msra.mxu1 %v4306_v58  ;;  %1565 = vmatprep.subr.bf16.mxu0 %v4311_v59  ;;  %v4398_v58 = vld [vmem:[#allocation5 + $0x44c] ss:$16 sps:$4 sm:$0xff]   ;;  %v4393_v59 = vld [vmem:[#allocation5 + $0x540] ss:$16 sps:$4 sm:$0xff]  }
  0xde   :  { %1713 = vmatprep.subr.bf16.mxu1 %v4314_v60  ;;  %v4396_v60 = vld [vmem:[#allocation5 + $0x448] ss:$16 sps:$4 sm:$0xff]  }
  0xe0   :  { %1566 = vmatpush1.bf16.msra.mxu0 %v4309_v61  ;;  %v4401_v61 = vld [vmem:[#allocation5 + $0x564] ss:$16 sps:$4 sm:$0xff]  }
  0xe1   :  { %1714 = vmatpush1.bf16.msra.mxu1 %v4312_v62  ;;  %1567 = vmatprep.subr.bf16.mxu0 %v4317_v63  ;;  %v4404_v62 = vld [vmem:[#allocation5 + $0x46c] ss:$16 sps:$4 sm:$0xff]   ;;  %v4399_v63 = vld [vmem:[#allocation5 + $0x560] ss:$16 sps:$4 sm:$0xff]  }
  0xe2   :  { %1715 = vmatprep.subr.bf16.mxu1 %v4320_v1  ;;  %v4402_v1 = vld [vmem:[#allocation5 + $0x468] ss:$16 sps:$4 sm:$0xff]  }
  0xe4   :  { %1568 = vmatpush1.bf16.msra.mxu0 %v4315_v2  ;;  %v4407_v2 = vld [vmem:[#allocation5 + $0x584] ss:$16 sps:$4 sm:$0xff]  }
  0xe5   :  { %1716 = vmatpush1.bf16.msra.mxu1 %v4318_v3  ;;  %1569 = vmatprep.subr.bf16.mxu0 %v4323_v4  ;;  %v4410_v3 = vld [vmem:[#allocation5 + $0x48c] ss:$16 sps:$4 sm:$0xff]   ;;  %v4405_v4 = vld [vmem:[#allocation5 + $0x580] ss:$16 sps:$4 sm:$0xff]  }
  0xe6   :  { %1717 = vmatprep.subr.bf16.mxu1 %v4326_v5  ;;  %v4408_v5 = vld [vmem:[#allocation5 + $0x488] ss:$16 sps:$4 sm:$0xff]  }
  0xe8   :  { %1570 = vmatpush1.bf16.msra.mxu0 %v4321_v6  ;;  %v4413_v6 = vld [vmem:[#allocation5 + $0x5a4] ss:$16 sps:$4 sm:$0xff]  }
  0xe9   :  { %1718 = vmatpush1.bf16.msra.mxu1 %v4324_v7  ;;  %1571 = vmatprep.subr.bf16.mxu0 %v4329_v8  ;;  %v4416_v7 = vld [vmem:[#allocation5 + $0x4ac] ss:$16 sps:$4 sm:$0xff]   ;;  %v4411_v8 = vld [vmem:[#allocation5 + $0x5a0] ss:$16 sps:$4 sm:$0xff]  }
  0xea   :  { %1719 = vmatprep.subr.bf16.mxu1 %v4332_v9  ;;  %v4414_v9 = vld [vmem:[#allocation5 + $0x4a8] ss:$16 sps:$4 sm:$0xff]  }
  0xec   :  { %1572 = vmatpush1.bf16.msra.mxu0 %v4327_v10  ;;  %v4419_v10 = vld [vmem:[#allocation5 + $0x5c4] ss:$16 sps:$4 sm:$0xff]  }
  0xed   :  { %1720 = vmatpush1.bf16.msra.mxu1 %v4330_v11  ;;  %1582 = vmatprep.subr.bf16.mxu0 %v4335_v13  ;;  %v4422_v11 = vld [vmem:[#allocation5 + $0x4cc] ss:$16 sps:$4 sm:$0xff]   ;;  %v4420_v13 = vld [vmem:[#allocation5 + $0x4c8] ss:$16 sps:$4 sm:$0xff]  }
  0xee   :  { %1721 = vmatprep.subr.bf16.mxu1 %v4338_v14  ;;  %v4425_v14 = vld [vmem:[#allocation5 + $0x5e4] ss:$16 sps:$4 sm:$0xff]  }
  0xef   :  { %1574 = vmatmul.mubr.bf16.vlgmr.msra.gmra.mrb[0].mxu0 %v5122_v16 }
  0xf0   :  { %1583 = vmatpush1.bf16.msra.mxu0 %v4333_v15  ;;  %1614 = vmatprep.mubr.bf16.mxu0 %v5124_v21  ;;  %v4428_v15 = vld [vmem:[#allocation5 + $0x4ec] ss:$16 sps:$4 sm:$0xff]  }
  0xf1   :  { %1722 = vmatpush1.bf16.msra.mxu1 %v4336_v17  ;;  %1584 = vmatprep.subr.bf16.mxu0 %v4341_v18  ;;  %v4426_v17 = vld [vmem:[#allocation5 + $0x4e8] ss:$16 sps:$4 sm:$0xff]  }
  0xf2   :  { %1723 = vmatprep.subr.bf16.mxu1 %v4344_v19  ;;  %v124_v18 = vld [vmem:[#allocation2 + $0x20] sm:$0xff] }
  0xf3   :  { %v4431_v19 = vld [vmem:[#allocation5 + $0x50c] ss:$16 sps:$4 sm:$0xff]  }
  0xf4   :  { %1585 = vmatpush1.bf16.msra.mxu0 %v4339_v22  ;;  %v4477_v22 = vld [vmem:[#allocation7] ss:$16 sps:$4 sm:$0xff]  }
  0xf5   :  { %1724 = vmatpush1.bf16.msra.mxu1 %v4342_v23  ;;  %1586 = vmatprep.subr.bf16.mxu0 %v4347_v24  ;;  %v5130_v23 = vpack.c.bf16 %v124_v18, %v124_v18  ;;  %v4434_v24 = vld [vmem:[#allocation5 + $0x52c] ss:$16 sps:$4 sm:$0xff]  }
  0xf6   :  { %1725 = vmatprep.subr.bf16.mxu1 %v4350_v25  ;;  %v4485_v25 = vld [vmem:[#allocation7 + $0x24] ss:$16 sps:$4 sm:$0xff]  }
  0xf8   :  { %1587 = vmatpush1.bf16.msra.mxu0 %v4345_v26  ;;  %v4432_v26 = vld [vmem:[#allocation5 + $0x528] ss:$16 sps:$4 sm:$0xff]  }
  0xf9   :  { %1726 = vmatpush1.bf16.msra.mxu1 %v4348_v27  ;;  %1588 = vmatprep.subr.bf16.mxu0 %v4353_v28  ;;  %v4483_v27 = vld [vmem:[#allocation7 + $0x20] ss:$16 sps:$4 sm:$0xff]   ;;  %v4437_v28 = vld [vmem:[#allocation5 + $0x54c] ss:$16 sps:$4 sm:$0xff]  }
  0xfa   :  { %1727 = vmatprep.subr.bf16.mxu1 %v4356_v29  ;;  %v4491_v29 = vld [vmem:[#allocation7 + $0x44] ss:$16 sps:$4 sm:$0xff]  }
  0xfc   :  { %1589 = vmatpush1.bf16.msra.mxu0 %v4351_v30  ;;  %v4435_v30 = vld [vmem:[#allocation5 + $0x548] ss:$16 sps:$4 sm:$0xff]  }
  0xfd   :  { %1728 = vmatpush1.bf16.msra.mxu1 %v4354_v31  ;;  %1590 = vmatprep.subr.bf16.mxu0 %v4359_v32  ;;  %v4489_v31 = vld [vmem:[#allocation7 + $0x40] ss:$16 sps:$4 sm:$0xff]   ;;  %v4440_v32 = vld [vmem:[#allocation5 + $0x56c] ss:$16 sps:$4 sm:$0xff]  }
  0xfe   :  { %1729 = vmatprep.subr.bf16.mxu1 %v4362_v33  ;;  %v4497_v33 = vld [vmem:[#allocation7 + $0x64] ss:$16 sps:$4 sm:$0xff]  }
 0x100   :  { %1591 = vmatpush1.bf16.msra.mxu0 %v4357_v34  ;;  %v4438_v34 = vld [vmem:[#allocation5 + $0x568] ss:$16 sps:$4 sm:$0xff]  }
 0x101   :  { %1730 = vmatpush1.bf16.msra.mxu1 %v4360_v35  ;;  %1592 = vmatprep.subr.bf16.mxu0 %v4365_v37  ;;  %v4495_v35 = vld [vmem:[#allocation7 + $0x60] ss:$16 sps:$4 sm:$0xff]   ;;  %v4443_v37 = vld [vmem:[#allocation5 + $0x58c] ss:$16 sps:$4 sm:$0xff]  }
 0x102   :  { %1731 = vmatprep.subr.bf16.mxu1 %v4368_v38  ;;  %v4503_v38 = vld [vmem:[#allocation7 + $0x84] ss:$16 sps:$4 sm:$0xff]  }
 0x104   :  { %1593 = vmatpush1.bf16.msra.mxu0 %v4363_v39  ;;  %v4441_v39 = vld [vmem:[#allocation5 + $0x588] ss:$16 sps:$4 sm:$0xff]  }
 0x105   :  { %1732 = vmatpush1.bf16.msra.mxu1 %v4366_v40  ;;  %1594 = vmatprep.subr.bf16.mxu0 %v4371_v41  ;;  %v4501_v40 = vld [vmem:[#allocation7 + $0x80] ss:$16 sps:$4 sm:$0xff]   ;;  %v4446_v41 = vld [vmem:[#allocation5 + $0x5ac] ss:$16 sps:$4 sm:$0xff]  }
 0x106   :  { %1733 = vmatprep.subr.bf16.mxu1 %v4374_v42  ;;  %v4509_v42 = vld [vmem:[#allocation7 + $0xa4] ss:$16 sps:$4 sm:$0xff]  }
 0x108   :  { %1595 = vmatpush1.bf16.msra.mxu0 %v4369_v43  ;;  %v4444_v43 = vld [vmem:[#allocation5 + $0x5a8] ss:$16 sps:$4 sm:$0xff]  }
 0x109   :  { %1734 = vmatpush1.bf16.msra.mxu1 %v4372_v44  ;;  %1596 = vmatprep.subr.bf16.mxu0 %v4377_v45  ;;  %v4507_v44 = vld [vmem:[#allocation7 + $0xa0] ss:$16 sps:$4 sm:$0xff]   ;;  %v4449_v45 = vld [vmem:[#allocation5 + $0x5cc] ss:$16 sps:$4 sm:$0xff]  }
 0x10a   :  { %1735 = vmatprep.subr.bf16.mxu1 %v4380_v46  ;;  %v4515_v46 = vld [vmem:[#allocation7 + $0xc4] ss:$16 sps:$4 sm:$0xff]  }
 0x10c   :  { %1597 = vmatpush1.bf16.msra.mxu0 %v4375_v47  ;;  %v4447_v47 = vld [vmem:[#allocation5 + $0x5c8] ss:$16 sps:$4 sm:$0xff]  }
 0x10d   :  { %1736 = vmatpush1.bf16.msra.mxu1 %v4378_v48  ;;  %1598 = vmatprep.subr.bf16.mxu0 %v4383_v49  ;;  %v4513_v48 = vld [vmem:[#allocation7 + $0xc0] ss:$16 sps:$4 sm:$0xff]   ;;  %v4452_v49 = vld [vmem:[#allocation5 + $0x5ec] ss:$16 sps:$4 sm:$0xff]  }
 0x10e   :  { %1746 = vmatprep.subr.bf16.mxu1 %v4386_v50  ;;  %v4521_v50 = vld [vmem:[#allocation7 + $0xe4] ss:$16 sps:$4 sm:$0xff]  }
 0x110   :  { %1738 = vmatmul.mubr.bf16.vlgmr.msra.gmra.mrb[4].mxu1 %v5122_v16  ;;  %1599 = vmatpush1.bf16.msra.mxu0 %v4381_v51  ;;  %v4423_v16 = vld [vmem:[#allocation5 + $0x5e0] ss:$16 sps:$4 sm:$0xff]   ;;  %v4450_v51 = vld [vmem:[#allocation5 + $0x5e8] ss:$16 sps:$4 sm:$0xff]  }
 0x111   :  { %1747 = vmatpush1.bf16.msra.mxu1 %v4384_v52  ;;  %1600 = vmatprep.subr.bf16.mxu0 %v4389_v53  ;;  %v4519_v52 = vld [vmem:[#allocation7 + $0xe0] ss:$16 sps:$4 sm:$0xff]   ;;  %v4455_v53 = vld [vmem:[#allocation5 + $0x60c] ss:$16 sps:$4 sm:$0xff]  }
 0x112   :  { %1748 = vmatprep.subr.bf16.mxu1 %v4392_v54  ;;  %1778 = vmatprep.mubr.bf16.mxu1 %v5124_v21  ;;  %v4429_v21 = vld [vmem:[#allocation5 + $0x508] ss:$16 sps:$4 sm:$0xff]   ;;  %v4527_v54 = vld [vmem:[#allocation7 + $0x104] ss:$16 sps:$4 sm:$0xff]  }
 0x114   :  { %1601 = vmatpush1.bf16.msra.mxu0 %v4387_v55  ;;  %v4453_v55 = vld [vmem:[#allocation5 + $0x608] ss:$16 sps:$4 sm:$0xff]  }
 0x115   :  { %1749 = vmatpush1.bf16.msra.mxu1 %v4390_v56  ;;  %1602 = vmatprep.subr.bf16.mxu0 %v4395_v57  ;;  %v4458_v56 = vld [vmem:[#allocation5 + $0x62c] ss:$16 sps:$4 sm:$0xff]   ;;  %v4525_v57 = vld [vmem:[#allocation7 + $0x100] ss:$16 sps:$4 sm:$0xff]  }
 0x116   :  { %1750 = vmatprep.subr.bf16.mxu1 %v4398_v58  ;;  %v4533_v58 = vld [vmem:[#allocation7 + $0x124] ss:$16 sps:$4 sm:$0xff]  }
 0x118   :  { %1603 = vmatpush1.bf16.msra.mxu0 %v4393_v59  ;;  %v4456_v59 = vld [vmem:[#allocation5 + $0x628] ss:$16 sps:$4 sm:$0xff]  }
 0x119   :  { %1751 = vmatpush1.bf16.msra.mxu1 %v4396_v60  ;;  %1604 = vmatprep.subr.bf16.mxu0 %v4401_v61  ;;  %v4461_v60 = vld [vmem:[#allocation5 + $0x64c] ss:$16 sps:$4 sm:$0xff]   ;;  %v4531_v61 = vld [vmem:[#allocation7 + $0x120] ss:$16 sps:$4 sm:$0xff]  }
 0x11a   :  { %1752 = vmatprep.subr.bf16.mxu1 %v4404_v62  ;;  %v4539_v62 = vld [vmem:[#allocation7 + $0x144] ss:$16 sps:$4 sm:$0xff]  }
 0x11c   :  { %1605 = vmatpush1.bf16.msra.mxu0 %v4399_v63  ;;  %v4459_v63 = vld [vmem:[#allocation5 + $0x648] ss:$16 sps:$4 sm:$0xff]  }
 0x11d   :  { %1753 = vmatpush1.bf16.msra.mxu1 %v4402_v1  ;;  %1606 = vmatprep.subr.bf16.mxu0 %v4407_v2  ;;  %v4464_v1 = vld [vmem:[#allocation5 + $0x66c] ss:$16 sps:$4 sm:$0xff]   ;;  %v4537_v2 = vld [vmem:[#allocation7 + $0x140] ss:$16 sps:$4 sm:$0xff]  }
 0x11e   :  { %1754 = vmatprep.subr.bf16.mxu1 %v4410_v3  ;;  %v4545_v3 = vld [vmem:[#allocation7 + $0x164] ss:$16 sps:$4 sm:$0xff]  }
 0x120   :  { %1607 = vmatpush1.bf16.msra.mxu0 %v4405_v4  ;;  %v4462_v4 = vld [vmem:[#allocation5 + $0x668] ss:$16 sps:$4 sm:$0xff]  }
 0x121   :  { %1755 = vmatpush1.bf16.msra.mxu1 %v4408_v5  ;;  %1608 = vmatprep.subr.bf16.mxu0 %v4413_v6  ;;  %v4467_v5 = vld [vmem:[#allocation5 + $0x68c] ss:$16 sps:$4 sm:$0xff]   ;;  %v4543_v6 = vld [vmem:[#allocation7 + $0x160] ss:$16 sps:$4 sm:$0xff]  }
 0x122   :  { %1756 = vmatprep.subr.bf16.mxu1 %v4416_v7  ;;  %v4551_v7 = vld [vmem:[#allocation7 + $0x184] ss:$16 sps:$4 sm:$0xff]  }
 0x124   :  { %1609 = vmatpush1.bf16.msra.mxu0 %v4411_v8  ;;  %v4470_v8 = vld [vmem:[#allocation5 + $0x6ac] ss:$16 sps:$4 sm:$0xff]  }
 0x125   :  { %1757 = vmatpush1.bf16.msra.mxu1 %v4414_v9  ;;  %1610 = vmatprep.subr.bf16.mxu0 %v4419_v10  ;;  %v4549_v9 = vld [vmem:[#allocation7 + $0x180] ss:$16 sps:$4 sm:$0xff]   ;;  %v4557_v10 = vld [vmem:[#allocation7 + $0x1a4] ss:$16 sps:$4 sm:$0xff]  }
 0x126   :  { %1758 = vmatprep.subr.bf16.mxu1 %v4422_v11  ;;  %v4468_v11 = vld [vmem:[#allocation5 + $0x6a8] ss:$16 sps:$4 sm:$0xff]  }
 0x128   :  { %1611 = vmatpush1.bf16.msra.mxu0 %v4417_v12  ;;  %v4473_v12 = vld [vmem:[#allocation5 + $0x6cc] ss:$16 sps:$4 sm:$0xff]  }
 0x129   :  { %1759 = vmatpush1.bf16.msra.mxu1 %v4420_v13  ;;  %1612 = vmatprep.subr.bf16.mxu0 %v4425_v14  ;;  %v4555_v13 = vld [vmem:[#allocation7 + $0x1a0] ss:$16 sps:$4 sm:$0xff]  }
 0x12a   :  { %1760 = vmatprep.subr.bf16.mxu1 %v4428_v15  ;;  %v4471_v15 = vld [vmem:[#allocation5 + $0x6c8] ss:$16 sps:$4 sm:$0xff]  }
 0x12c   :  { %1613 = vmatpush1.bf16.msra.mxu0 %v4423_v16 }
 0x12d   :  { %1761 = vmatpush1.bf16.msra.mxu1 %v4426_v17  ;;  %2626 = vmatprep.subr.bf16.mxu0 %v4479_v20  ;;  %v4476_v17 = vld [vmem:[#allocation5 + $0x6ec] ss:$16 sps:$4 sm:$0xff]   ;;  %v4474_v20 = vld [vmem:[#allocation5 + $0x6e8] ss:$16 sps:$4 sm:$0xff]  }
 0x12e   :  { %1762 = vmatprep.subr.bf16.mxu1 %v4431_v19 }
 0x12f   :  { %1615 = vmatmul.mubr.bf16.vlgmr.msra.gmra.mrb[0].mxu0 %v5130_v23 }
 0x130   :  { %2627 = vmatpush1.bf16.msra.mxu0 %v4477_v22  ;;  %v4480_v22 = vld [vmem:[#allocation7 + $0x8] ss:$16 sps:$4 sm:$0xff]  }
 0x131   :  { %1763 = vmatpush1.bf16.msra.mxu1 %v4429_v21  ;;  %2628 = vmatprep.subr.bf16.mxu0 %v4485_v25  ;;  %v4482_v21 = vld [vmem:[#allocation7 + $0xc] ss:$16 sps:$4 sm:$0xff]  }
 0x132   :  { %1764 = vmatprep.subr.bf16.mxu1 %v4434_v24  ;;  %v4486_v24 = vld [vmem:[#allocation7 + $0x28] ss:$16 sps:$4 sm:$0xff]   ;;  %v4494_v25 = vld [vmem:[#allocation7 + $0x4c] ss:$16 sps:$4 sm:$0xff]  }
 0x134   :  { %2629 = vmatpush1.bf16.msra.mxu0 %v4483_v27  ;;  %v4500_v27 = vld [vmem:[#allocation7 + $0x6c] ss:$16 sps:$4 sm:$0xff]  }
 0x135   :  { %1765 = vmatpush1.bf16.msra.mxu1 %v4432_v26  ;;  %2630 = vmatprep.subr.bf16.mxu0 %v4491_v29  ;;  %v4492_v26 = vld [vmem:[#allocation7 + $0x48] ss:$16 sps:$4 sm:$0xff]   ;;  %v4506_v29 = vld [vmem:[#allocation7 + $0x8c] ss:$16 sps:$4 sm:$0xff]  }
 0x136   :  { %1766 = vmatprep.subr.bf16.mxu1 %v4437_v28  ;;  %v4498_v28 = vld [vmem:[#allocation7 + $0x68] ss:$16 sps:$4 sm:$0xff]  }
 0x138   :  { %2631 = vmatpush1.bf16.msra.mxu0 %v4489_v31  ;;  %v4512_v31 = vld [vmem:[#allocation7 + $0xac] ss:$16 sps:$4 sm:$0xff]  }
 0x139   :  { %1767 = vmatpush1.bf16.msra.mxu1 %v4435_v30  ;;  %2632 = vmatprep.subr.bf16.mxu0 %v4497_v33  ;;  %v4504_v30 = vld [vmem:[#allocation7 + $0x88] ss:$16 sps:$4 sm:$0xff]   ;;  %v4563_v33 = vld [vmem:[#allocation7 + $0x1c4] ss:$16 sps:$4 sm:$0xff]  }
 0x13a   :  { %1768 = vmatprep.subr.bf16.mxu1 %v4440_v32  ;;  %v4510_v32 = vld [vmem:[#allocation7 + $0xa8] ss:$16 sps:$4 sm:$0xff]  }
 0x13c   :  { %2633 = vmatpush1.bf16.msra.mxu0 %v4495_v35  ;;  %v4516_v35 = vld [vmem:[#allocation7 + $0xc8] ss:$16 sps:$4 sm:$0xff]  }
 0x13d   :  { %1769 = vmatpush1.bf16.msra.mxu1 %v4438_v34  ;;  %2634 = vmatprep.subr.bf16.mxu0 %v4503_v38  ;;  %v4561_v34 = vld [vmem:[#allocation7 + $0x1c0] ss:$16 sps:$4 sm:$0xff]   ;;  %v4569_v38 = vld [vmem:[#allocation7 + $0x1e4] ss:$16 sps:$4 sm:$0xff]  }
 0x13e   :  { %1770 = vmatprep.subr.bf16.mxu1 %v4443_v37  ;;  %v4524_v37 = vld [vmem:[#allocation7 + $0xec] ss:$16 sps:$4 sm:$0xff]  }
 0x140   :  { %2635 = vmatpush1.bf16.msra.mxu0 %v4501_v40  ;;  %v4522_v40 = vld [vmem:[#allocation7 + $0xe8] ss:$16 sps:$4 sm:$0xff]  }
 0x141   :  { %1771 = vmatpush1.bf16.msra.mxu1 %v4441_v39  ;;  %2636 = vmatprep.subr.bf16.mxu0 %v4509_v42  ;;  %v4567_v39 = vld [vmem:[#allocation7 + $0x1e0] ss:$16 sps:$4 sm:$0xff]   ;;  %v4575_v42 = vld [vmem:[#allocation7 + $0x204] ss:$16 sps:$4 sm:$0xff]  }
 0x142   :  { %1772 = vmatprep.subr.bf16.mxu1 %v4446_v41  ;;  %v4530_v41 = vld [vmem:[#allocation7 + $0x10c] ss:$16 sps:$4 sm:$0xff]  }
 0x144   :  { %2637 = vmatpush1.bf16.msra.mxu0 %v4507_v44  ;;  %v4536_v44 = vld [vmem:[#allocation7 + $0x12c] ss:$16 sps:$4 sm:$0xff]  }
 0x145   :  { %1773 = vmatpush1.bf16.msra.mxu1 %v4444_v43  ;;  %2638 = vmatprep.subr.bf16.mxu0 %v4515_v46  ;;  %v4528_v43 = vld [vmem:[#allocation7 + $0x108] ss:$16 sps:$4 sm:$0xff]   ;;  %v4542_v46 = vld [vmem:[#allocation7 + $0x14c] ss:$16 sps:$4 sm:$0xff]  }
 0x146   :  { %1774 = vmatprep.subr.bf16.mxu1 %v4449_v45  ;;  %v4534_v45 = vld [vmem:[#allocation7 + $0x128] ss:$16 sps:$4 sm:$0xff]  }
 0x148   :  { %2639 = vmatpush1.bf16.msra.mxu0 %v4513_v48  ;;  %v4548_v48 = vld [vmem:[#allocation7 + $0x16c] ss:$16 sps:$4 sm:$0xff]  }
 0x149   :  { %1775 = vmatpush1.bf16.msra.mxu1 %v4447_v47  ;;  %2640 = vmatprep.subr.bf16.mxu0 %v4521_v50  ;;  %v4540_v47 = vld [vmem:[#allocation7 + $0x148] ss:$16 sps:$4 sm:$0xff]   ;;  %v4554_v50 = vld [vmem:[#allocation7 + $0x18c] ss:$16 sps:$4 sm:$0xff]  }
 0x14a   :  { %1776 = vmatprep.subr.bf16.mxu1 %v4452_v49  ;;  %v4546_v49 = vld [vmem:[#allocation7 + $0x168] ss:$16 sps:$4 sm:$0xff]  }
 0x14c   :  { %2641 = vmatpush1.bf16.msra.mxu0 %v4519_v52  ;;  %v4560_v52 = vld [vmem:[#allocation7 + $0x1ac] ss:$16 sps:$4 sm:$0xff]  }
 0x14d   :  { %1777 = vmatpush1.bf16.msra.mxu1 %v4450_v51  ;;  %2642 = vmatprep.subr.bf16.mxu0 %v4527_v54  ;;  %v4552_v51 = vld [vmem:[#allocation7 + $0x188] ss:$16 sps:$4 sm:$0xff]   ;;  %v4566_v54 = vld [vmem:[#allocation7 + $0x1cc] ss:$16 sps:$4 sm:$0xff]  }
 0x14e   :  { %1787 = vmatprep.subr.bf16.mxu1 %v4455_v53  ;;  %v4558_v53 = vld [vmem:[#allocation7 + $0x1a8] ss:$16 sps:$4 sm:$0xff]  }
 0x150   :  { %1779 = vmatmul.mubr.bf16.vlgmr.msra.gmra.mrb[4].mxu1 %v5130_v23  ;;  %2643 = vmatpush1.bf16.msra.mxu0 %v4525_v57  ;;  %v4488_v23 = vld [vmem:[#allocation7 + $0x2c] ss:$16 sps:$4 sm:$0xff]   ;;  %v4570_v57 = vld [vmem:[#allocation7 + $0x1e8] ss:$16 sps:$4 sm:$0xff]  }
 0x151   :  { %1788 = vmatpush1.bf16.msra.mxu1 %v4453_v55  ;;  %1819 = vmatprep.mubr.bf16.mxu1 %v4965_v0  ;;  %v4465_v0 = vld [vmem:[#allocation5 + $0x688] ss:$16 sps:$4 sm:$0xff]  }
 0x152   :  { %1789 = vmatprep.subr.bf16.mxu1 %v4458_v56  ;;  %2644 = vmatprep.subr.bf16.mxu0 %v4533_v58  ;;  %v4564_v55 = vld [vmem:[#allocation7 + $0x1c8] ss:$16 sps:$4 sm:$0xff]   ;;  %v4572_v56 = vld [vmem:[#allocation7 + $0x1ec] ss:$16 sps:$4 sm:$0xff]  }
 0x153   :  { %v4578_v58 = vld [vmem:[#allocation7 + $0x20c] ss:$16 sps:$4 sm:$0xff]  }
 0x154   :  { %2645 = vmatpush1.bf16.msra.mxu0 %v4531_v61 }
 0x155   :  { %1790 = vmatpush1.bf16.msra.mxu1 %v4456_v59  ;;  %2646 = vmatprep.subr.bf16.mxu0 %v4539_v62  ;;  %v360_v59 = vlaneseq  ;;  %v5148_v62 = vld [vmem:[%s5210_s2] sm:$0xf] }
 0x156   :  { %1791 = vmatprep.subr.bf16.mxu1 %v4461_v60 }
 0x157   :  { %v5140_v60 = vshrl.u32 %v360_v59, 7  ;;  %v4642_v59 = vld [vmem:[#allocation7 + $0x368] ss:$16 sps:$4 sm:$0xff]  }
 0x158   :  { %2647 = vmatpush1.bf16.msra.mxu0 %v4537_v2 }
 0x159   :  { %1792 = vmatpush1.bf16.msra.mxu1 %v4459_v63  ;;  %2648 = vmatprep.subr.bf16.mxu0 %v4545_v3  ;;  %v5143_v61 = vsub.s32 0, %v5140_v60  ;;  %v5151_v63 = vsub.s32 1, %v5140_v60 }
 0x15a   :  { %1793 = vmatprep.subr.bf16.mxu1 %v4464_v1 }
 0x15b   :  { %v363_v1 = vrot.slane %v5148_v62, %v5143_v61  ;;  %v367_v2 = vrot.slane %v5148_v62, %v5151_v63 }
 0x15c   :  { %2649 = vmatpush1.bf16.msra.mxu0 %v4543_v6 }
 0x15d   :  { %1794 = vmatpush1.bf16.msra.mxu1 %v4462_v4  ;;  %2650 = vmatprep.subr.bf16.mxu0 %v4551_v7 }
 0x15e   :  { %1795 = vmatprep.subr.bf16.mxu1 %v4467_v5 }
 0x160   :  { %2651 = vmatpush1.bf16.msra.mxu0 %v4549_v9 }
 0x161   :  { %1796 = vmatpush1.bf16.msra.mxu1 %v4465_v0  ;;  %2652 = vmatprep.subr.bf16.mxu0 %v4557_v10 }
 0x162   :  { %1797 = vmatprep.subr.bf16.mxu1 %v4470_v8 }
 0x163   :  { %v5135_v14 = vpop.f32.mrb[0].mxu1 }
 0x164   :  { %v5137_v16 = vpop.f32.mrb[1].mxu1  ;;  %2653 = vmatpush1.bf16.msra.mxu0 %v4555_v13  ;;  %v4573_v13 = vld [vmem:[#allocation7 + $0x200] ss:$16 sps:$4 sm:$0xff]  }
 0x165   :  { %v1661_v18 = vpop.f32.mrb[2].mxu1  ;;  %1798 = vmatpush1.bf16.msra.mxu1 %v4468_v11  ;;  %2654 = vmatprep.subr.bf16.mxu0 %v4563_v33  ;;  %v4603_v33 = vld [vmem:[#allocation7 + $0x2a0] ss:$16 sps:$4 sm:$0xff]  }
 0x166   :  { %v1662_v19 = vpop.f32.mrb[3].mxu1  ;;  %1799 = vmatprep.subr.bf16.mxu1 %v4473_v12  ;;  %v4581_v18 = vld [vmem:[#allocation7 + $0x224] ss:$16 sps:$4 sm:$0xff]  }
 0x167   :  { %v4584_v19 = vld [vmem:[#allocation7 + $0x22c] ss:$16 sps:$4 sm:$0xff]  }
 0x168   :  { %2655 = vmatpush1.bf16.msra.mxu0 %v4561_v34  ;;  %v4606_v34 = vld [vmem:[#allocation7 + $0x2a8] ss:$16 sps:$4 sm:$0xff]  }
 0x169   :  { %1800 = vmatpush1.bf16.msra.mxu1 %v4471_v15  ;;  %2656 = vmatprep.subr.bf16.mxu0 %v4569_v38  ;;  %v4576_v15 = vld [vmem:[#allocation7 + $0x208] ss:$16 sps:$4 sm:$0xff]   ;;  %v4609_v38 = vld [vmem:[#allocation7 + $0x2c0] ss:$16 sps:$4 sm:$0xff]  }
 0x16a   :  { %1801 = vmatprep.subr.bf16.mxu1 %v4476_v17 }
 0x16c   :  { %2657 = vmatpush1.bf16.msra.mxu0 %v4567_v39  ;;  %v4612_v39 = vld [vmem:[#allocation7 + $0x2c8] ss:$16 sps:$4 sm:$0xff]  }
 0x16d   :  { %1802 = vmatpush1.bf16.msra.mxu1 %v4474_v20  ;;  %2667 = vmatprep.subr.bf16.mxu0 %v4575_v42  ;;  %v4579_v20 = vld [vmem:[#allocation7 + $0x220] ss:$16 sps:$4 sm:$0xff]  }
 0x16e   :  { %2708 = vmatprep.subr.bf16.mxu1 %v4482_v21  ;;  %v4582_v21 = vld [vmem:[#allocation7 + $0x228] ss:$16 sps:$4 sm:$0xff]   ;;  %v4615_v42 = vld [vmem:[#allocation7 + $0x2e0] ss:$16 sps:$4 sm:$0xff]  }
 0x170   :  { %1820 = vmatmul.mubr.bf16.vlgmr.msra.gmra.mrb[4].mxu1 %v5115_v36  ;;  %v4518_v36 = vld [vmem:[#allocation7 + $0xcc] ss:$16 sps:$4 sm:$0xff]  }
 0x171   :  { %2709 = vmatpush1.bf16.msra.mxu1 %v4480_v22  ;;  %v4585_v22 = vld [vmem:[#allocation7 + $0x240] ss:$16 sps:$4 sm:$0xff]  }
 0x172   :  { %2710 = vmatprep.subr.bf16.mxu1 %v4488_v23  ;;  %v4588_v23 = vld [vmem:[#allocation7 + $0x248] ss:$16 sps:$4 sm:$0xff]  }
 0x175   :  { %2711 = vmatpush1.bf16.msra.mxu1 %v4486_v24  ;;  %v4593_v24 = vld [vmem:[#allocation7 + $0x264] ss:$16 sps:$4 sm:$0xff]  }
 0x176   :  { %2712 = vmatprep.subr.bf16.mxu1 %v4494_v25  ;;  %v4596_v25 = vld [vmem:[#allocation7 + $0x26c] ss:$16 sps:$4 sm:$0xff]  }
 0x179   :  { %2713 = vmatpush1.bf16.msra.mxu1 %v4492_v26  ;;  %v4591_v26 = vld [vmem:[#allocation7 + $0x260] ss:$16 sps:$4 sm:$0xff]  }
 0x17a   :  { %2714 = vmatprep.subr.bf16.mxu1 %v4500_v27  ;;  %v4594_v27 = vld [vmem:[#allocation7 + $0x268] ss:$16 sps:$4 sm:$0xff]  }
 0x17d   :  { %2715 = vmatpush1.bf16.msra.mxu1 %v4498_v28  ;;  %v4599_v28 = vld [vmem:[#allocation7 + $0x284] ss:$16 sps:$4 sm:$0xff]  }
 0x17e   :  { %2716 = vmatprep.subr.bf16.mxu1 %v4506_v29  ;;  %v4602_v29 = vld [vmem:[#allocation7 + $0x28c] ss:$16 sps:$4 sm:$0xff]  }
 0x181   :  { %2717 = vmatpush1.bf16.msra.mxu1 %v4504_v30  ;;  %v4597_v30 = vld [vmem:[#allocation7 + $0x280] ss:$16 sps:$4 sm:$0xff]  }
 0x182   :  { %2718 = vmatprep.subr.bf16.mxu1 %v4512_v31  ;;  %v4600_v31 = vld [vmem:[#allocation7 + $0x288] ss:$16 sps:$4 sm:$0xff]  }
 0x185   :  { %2719 = vmatpush1.bf16.msra.mxu1 %v4510_v32  ;;  %v4605_v32 = vld [vmem:[#allocation7 + $0x2a4] ss:$16 sps:$4 sm:$0xff]  }
 0x186   :  { %2720 = vmatprep.subr.bf16.mxu1 %v4518_v36  ;;  %v4608_v36 = vld [vmem:[#allocation7 + $0x2ac] ss:$16 sps:$4 sm:$0xff]  }
 0x189   :  { %2721 = vmatpush1.bf16.msra.mxu1 %v4516_v35  ;;  %v4611_v35 = vld [vmem:[#allocation7 + $0x2c4] ss:$16 sps:$4 sm:$0xff]  }
 0x18a   :  { %2722 = vmatprep.subr.bf16.mxu1 %v4524_v37  ;;  %v4614_v37 = vld [vmem:[#allocation7 + $0x2cc] ss:$16 sps:$4 sm:$0xff]  }
 0x18d   :  { %2723 = vmatpush1.bf16.msra.mxu1 %v4522_v40  ;;  %v4617_v40 = vld [vmem:[#allocation7 + $0x2e4] ss:$16 sps:$4 sm:$0xff]  }
 0x18e   :  { %2724 = vmatprep.subr.bf16.mxu1 %v4530_v41  ;;  %v4620_v41 = vld [vmem:[#allocation7 + $0x2ec] ss:$16 sps:$4 sm:$0xff]  }
 0x191   :  { %2725 = vmatpush1.bf16.msra.mxu1 %v4528_v43  ;;  %v4618_v43 = vld [vmem:[#allocation7 + $0x2e8] ss:$16 sps:$4 sm:$0xff]  }
 0x192   :  { %2726 = vmatprep.subr.bf16.mxu1 %v4536_v44  ;;  %v4623_v44 = vld [vmem:[#allocation7 + $0x304] ss:$16 sps:$4 sm:$0xff]  }
 0x195   :  { %2727 = vmatpush1.bf16.msra.mxu1 %v4534_v45  ;;  %v4626_v45 = vld [vmem:[#allocation7 + $0x30c] ss:$16 sps:$4 sm:$0xff]  }
 0x196   :  { %2728 = vmatprep.subr.bf16.mxu1 %v4542_v46  ;;  %v4621_v46 = vld [vmem:[#allocation7 + $0x300] ss:$16 sps:$4 sm:$0xff]  }
 0x199   :  { %2729 = vmatpush1.bf16.msra.mxu1 %v4540_v47  ;;  %v4624_v47 = vld [vmem:[#allocation7 + $0x308] ss:$16 sps:$4 sm:$0xff]  }
 0x19a   :  { %2730 = vmatprep.subr.bf16.mxu1 %v4548_v48  ;;  %v4629_v48 = vld [vmem:[#allocation7 + $0x324] ss:$16 sps:$4 sm:$0xff]  }
 0x19d   :  { %2731 = vmatpush1.bf16.msra.mxu1 %v4546_v49  ;;  %v4632_v49 = vld [vmem:[#allocation7 + $0x32c] ss:$16 sps:$4 sm:$0xff]  }
 0x19e   :  { %2732 = vmatprep.subr.bf16.mxu1 %v4554_v50  ;;  %v4627_v50 = vld [vmem:[#allocation7 + $0x320] ss:$16 sps:$4 sm:$0xff]  }
 0x1a1   :  { %2733 = vmatpush1.bf16.msra.mxu1 %v4552_v51  ;;  %v4630_v51 = vld [vmem:[#allocation7 + $0x328] ss:$16 sps:$4 sm:$0xff]  }
 0x1a2   :  { %2734 = vmatprep.subr.bf16.mxu1 %v4560_v52  ;;  %v4635_v52 = vld [vmem:[#allocation7 + $0x344] ss:$16 sps:$4 sm:$0xff]  }
 0x1a5   :  { %2735 = vmatpush1.bf16.msra.mxu1 %v4558_v53  ;;  %v4638_v53 = vld [vmem:[#allocation7 + $0x34c] ss:$16 sps:$4 sm:$0xff]  }
 0x1a6   :  { %2736 = vmatprep.subr.bf16.mxu1 %v4566_v54  ;;  %v4633_v54 = vld [vmem:[#allocation7 + $0x340] ss:$16 sps:$4 sm:$0xff]  }
 0x1a9   :  { %2737 = vmatpush1.bf16.msra.mxu1 %v4564_v55  ;;  %v4636_v55 = vld [vmem:[#allocation7 + $0x348] ss:$16 sps:$4 sm:$0xff]  }
 0x1aa   :  { %2738 = vmatprep.subr.bf16.mxu1 %v4572_v56  ;;  %v4641_v56 = vld [vmem:[#allocation7 + $0x364] ss:$16 sps:$4 sm:$0xff]  }
 0x1ad   :  { %2739 = vmatpush1.bf16.msra.mxu1 %v4570_v57  ;;  %v4644_v57 = vld [vmem:[#allocation7 + $0x36c] ss:$16 sps:$4 sm:$0xff]  }
 0x1ae   :  { %2749 = vmatprep.subr.bf16.mxu1 %v4578_v58  ;;  %v4639_v58 = vld [vmem:[#allocation7 + $0x360] ss:$16 sps:$4 sm:$0xff]  }
 0x202   :  { %v1616_v3 = vpop.f32.mrb[0].mxu0 }
 0x203   :  { %v4081_v4 = vadd.f32 %v1616_v3, %v363_v1  ;;  %v1618_v5 = vpop.f32.mrb[1].mxu0  ;;  %v4647_v1 = vld [vmem:[#allocation7 + $0x384] ss:$16 sps:$4 sm:$0xff]   ;;  %v4645_v3 = vld [vmem:[#allocation7 + $0x380] ss:$16 sps:$4 sm:$0xff]  }
 0x204   :  { %v4083_v6 = vadd.f32 %v1618_v5, %v367_v2  ;;  %v1620_v7 = vpop.f32.mrb[2].mxu0  ;;  %v4650_v2 = vld [vmem:[#allocation7 + $0x38c] ss:$16 sps:$4 sm:$0xff]   ;;  %v4653_v5 = vld [vmem:[#allocation7 + $0x3a4] ss:$16 sps:$4 sm:$0xff]  }
 0x205   :  { %v4082_v0 = vadd.f32 %v4081_v4, %v5135_v14  ;;  %v1621_v8 = vpop.f32.mrb[3].mxu0  ;;  %v4587_v14 = vld [vmem:[#allocation7 + $0x244] ss:$16 sps:$4 sm:$0xff]   ;;  %v4648_v4 = vld [vmem:[#allocation7 + $0x388] ss:$16 sps:$4 sm:$0xff]   ;;  %v370_v7 = vsub.s32 2, %v5140_v60 }
 0x206   :  { %v4084_v9 = vadd.f32 %v4083_v6, %v5137_v16  ;;  %v4590_v16 = vld [vmem:[#allocation7 + $0x24c] ss:$16 sps:$4 sm:$0xff]   ;;  %v4651_v8 = vld [vmem:[#allocation7 + $0x3a0] ss:$16 sps:$4 sm:$0xff]  }
 0x207   :  { %v1828_v10 = vmax.f32 %v4082_v0, 0.0  ;;  %v4656_v6 = vld [vmem:[#allocation7 + $0x3ac] ss:$16 sps:$4 sm:$0xff]   ;;  %v374_v0 = vsub.s32 3, %v5140_v60 }
 0x208   :  { %v1829_v11 = vmax.f32 %v4084_v9, 0.0  ;;  %v4654_v9 = vld [vmem:[#allocation7 + $0x3a8] ss:$16 sps:$4 sm:$0xff]  }
 0x209   :  { %v1832_v17 = vpack.c.bf16 %v1828_v10, %v1828_v10  ;;  %v371_v10 = vrot.slane %v5148_v62, %v370_v7  ;;  %v4779_v60 = vld [vmem:[#allocation10 + $0x78] sm:$0xff]  }
 0x20a   :  { %v1833_v12 = vpack.c.bf16 %v1829_v11, %v1829_v11  ;;  %v4659_v11 = vld [vmem:[#allocation7 + $0x3c4] ss:$16 sps:$4 sm:$0xff]  }
 0x20c   :  { %2658 = vmatprep.mubr.bf16.mxu0 %v1833_v12  ;;  %2740 = vmatprep.mubr.bf16.mxu1 %v1833_v12  ;;  %v4662_v12 = vld [vmem:[#allocation7 + $0x3cc] ss:$16 sps:$4 sm:$0xff]  }
 0x20d   :  { %2659 = vmatmul.mubr.bf16.vlgmr.msra.gmra.mrb[4].mxu0 %v1832_v17  ;;  %2741 = vmatmul.mubr.bf16.vlgmr.msra.gmra.mrb[8].mxu1 %v1832_v17  ;;  %v4657_v17 = vld [vmem:[#allocation7 + $0x3c0] ss:$16 sps:$4 sm:$0xff]  }
 0x20e   :  { %2668 = vmatpush1.bf16.msra.mxu0 %v4573_v13  ;;  %2750 = vmatpush1.bf16.msra.mxu1 %v4576_v15  ;;  %v375_v13 = vrot.slane %v5148_v62, %v374_v0 }
 0x20f   :  { %2669 = vmatprep.subr.bf16.mxu0 %v4581_v18  ;;  %2751 = vmatprep.subr.bf16.mxu1 %v4584_v19  ;;  %v4660_v18 = vld [vmem:[#allocation7 + $0x3c8] ss:$16 sps:$4 sm:$0xff]  }
 0x212   :  { %2670 = vmatpush1.bf16.msra.mxu0 %v4579_v20  ;;  %2752 = vmatpush1.bf16.msra.mxu1 %v4582_v21  ;;  %v4665_v21 = vld [vmem:[#allocation7 + $0x3e4] ss:$16 sps:$4 sm:$0xff]  }
 0x213   :  { %2671 = vmatprep.subr.bf16.mxu0 %v4587_v14  ;;  %2753 = vmatprep.subr.bf16.mxu1 %v4590_v16  ;;  %v4668_v14 = vld [vmem:[#allocation7 + $0x3ec] ss:$16 sps:$4 sm:$0xff]  }
 0x216   :  { %2672 = vmatpush1.bf16.msra.mxu0 %v4585_v22  ;;  %2754 = vmatpush1.bf16.msra.mxu1 %v4588_v23 }
 0x217   :  { %2673 = vmatprep.subr.bf16.mxu0 %v4593_v24  ;;  %2755 = vmatprep.subr.bf16.mxu1 %v4596_v25  ;;  %v4663_v25 = vld [vmem:[#allocation7 + $0x3e0] ss:$16 sps:$4 sm:$0xff]  }
 0x21a   :  { %2674 = vmatpush1.bf16.msra.mxu0 %v4591_v26  ;;  %2756 = vmatpush1.bf16.msra.mxu1 %v4594_v27  ;;  %v4666_v26 = vld [vmem:[#allocation7 + $0x3e8] ss:$16 sps:$4 sm:$0xff]  }
 0x21b   :  { %2675 = vmatprep.subr.bf16.mxu0 %v4599_v28  ;;  %2757 = vmatprep.subr.bf16.mxu1 %v4602_v29  ;;  %v4671_v28 = vld [vmem:[#allocation8 + $0x4] ss:$8 sps:$4 sm:$0xff]   ;;  %v4669_v29 = vld [vmem:[#allocation8] ss:$8 sps:$4 sm:$0xff]  }
 0x21e   :  { %2676 = vmatpush1.bf16.msra.mxu0 %v4597_v30  ;;  %2758 = vmatpush1.bf16.msra.mxu1 %v4600_v31  ;;  %v4674_v31 = vld [vmem:[#allocation8 + $0x14] ss:$8 sps:$4 sm:$0xff]  }
 0x21f   :  { %2677 = vmatprep.subr.bf16.mxu0 %v4605_v32  ;;  %2759 = vmatprep.subr.bf16.mxu1 %v4608_v36  ;;  %v4672_v32 = vld [vmem:[#allocation8 + $0x10] ss:$8 sps:$4 sm:$0xff]   ;;  %v4677_v36 = vld [vmem:[#allocation8 + $0x24] ss:$8 sps:$4 sm:$0xff]  }
 0x222   :  { %2678 = vmatpush1.bf16.msra.mxu0 %v4603_v33  ;;  %2760 = vmatpush1.bf16.msra.mxu1 %v4606_v34  ;;  %v4675_v33 = vld [vmem:[#allocation8 + $0x20] ss:$8 sps:$4 sm:$0xff]   ;;  %v4680_v34 = vld [vmem:[#allocation8 + $0x34] ss:$8 sps:$4 sm:$0xff]  }
 0x223   :  { %2679 = vmatprep.subr.bf16.mxu0 %v4611_v35  ;;  %2761 = vmatprep.subr.bf16.mxu1 %v4614_v37  ;;  %v4678_v35 = vld [vmem:[#allocation8 + $0x30] ss:$8 sps:$4 sm:$0xff]   ;;  %v4683_v37 = vld [vmem:[#allocation8 + $0x44] ss:$8 sps:$4 sm:$0xff]  }
 0x226   :  { %2680 = vmatpush1.bf16.msra.mxu0 %v4609_v38  ;;  %2762 = vmatpush1.bf16.msra.mxu1 %v4612_v39  ;;  %v4681_v38 = vld [vmem:[#allocation8 + $0x40] ss:$8 sps:$4 sm:$0xff]   ;;  %v4686_v39 = vld [vmem:[#allocation8 + $0x54] ss:$8 sps:$4 sm:$0xff]  }
 0x227   :  { %2681 = vmatprep.subr.bf16.mxu0 %v4617_v40  ;;  %2763 = vmatprep.subr.bf16.mxu1 %v4620_v41  ;;  %v4684_v40 = vld [vmem:[#allocation8 + $0x50] ss:$8 sps:$4 sm:$0xff]   ;;  %v4689_v41 = vld [vmem:[#allocation8 + $0x64] ss:$8 sps:$4 sm:$0xff]  }
 0x22a   :  { %2682 = vmatpush1.bf16.msra.mxu0 %v4615_v42  ;;  %2764 = vmatpush1.bf16.msra.mxu1 %v4618_v43  ;;  %v4687_v42 = vld [vmem:[#allocation8 + $0x60] ss:$8 sps:$4 sm:$0xff]   ;;  %v4692_v43 = vld [vmem:[#allocation8 + $0x74] ss:$8 sps:$4 sm:$0xff]  }
 0x22b   :  { %2683 = vmatprep.subr.bf16.mxu0 %v4623_v44  ;;  %2765 = vmatprep.subr.bf16.mxu1 %v4626_v45  ;;  %v4690_v44 = vld [vmem:[#allocation8 + $0x70] ss:$8 sps:$4 sm:$0xff]   ;;  %v4695_v45 = vld [vmem:[#allocation8 + $0x84] ss:$8 sps:$4 sm:$0xff]  }
 0x22e   :  { %2684 = vmatpush1.bf16.msra.mxu0 %v4621_v46  ;;  %2766 = vmatpush1.bf16.msra.mxu1 %v4624_v47  ;;  %v4693_v46 = vld [vmem:[#allocation8 + $0x80] ss:$8 sps:$4 sm:$0xff]   ;;  %v4698_v47 = vld [vmem:[#allocation8 + $0x94] ss:$8 sps:$4 sm:$0xff]  }
 0x22f   :  { %2685 = vmatprep.subr.bf16.mxu0 %v4629_v48  ;;  %2767 = vmatprep.subr.bf16.mxu1 %v4632_v49  ;;  %v4696_v48 = vld [vmem:[#allocation8 + $0x90] ss:$8 sps:$4 sm:$0xff]   ;;  %v4701_v49 = vld [vmem:[#allocation8 + $0xa4] ss:$8 sps:$4 sm:$0xff]  }
 0x232   :  { %2686 = vmatpush1.bf16.msra.mxu0 %v4627_v50  ;;  %2768 = vmatpush1.bf16.msra.mxu1 %v4630_v51  ;;  %v4699_v50 = vld [vmem:[#allocation8 + $0xa0] ss:$8 sps:$4 sm:$0xff]   ;;  %v4704_v51 = vld [vmem:[#allocation8 + $0xb4] ss:$8 sps:$4 sm:$0xff]  }
 0x233   :  { %2687 = vmatprep.subr.bf16.mxu0 %v4635_v52  ;;  %2769 = vmatprep.subr.bf16.mxu1 %v4638_v53  ;;  %v4702_v52 = vld [vmem:[#allocation8 + $0xb0] ss:$8 sps:$4 sm:$0xff]   ;;  %v4707_v53 = vld [vmem:[#allocation8 + $0xc4] ss:$8 sps:$4 sm:$0xff]  }
 0x236   :  { %2688 = vmatpush1.bf16.msra.mxu0 %v4633_v54  ;;  %2770 = vmatpush1.bf16.msra.mxu1 %v4636_v55  ;;  %v4705_v54 = vld [vmem:[#allocation8 + $0xc0] ss:$8 sps:$4 sm:$0xff]   ;;  %v4710_v55 = vld [vmem:[#allocation8 + $0xd4] ss:$8 sps:$4 sm:$0xff]  }
 0x237   :  { %2689 = vmatprep.subr.bf16.mxu0 %v4641_v56  ;;  %2771 = vmatprep.subr.bf16.mxu1 %v4644_v57  ;;  %v4708_v56 = vld [vmem:[#allocation8 + $0xd0] ss:$8 sps:$4 sm:$0xff]   ;;  %v4713_v57 = vld [vmem:[#allocation8 + $0xe4] ss:$8 sps:$4 sm:$0xff]  }
 0x23a   :  { %2690 = vmatpush1.bf16.msra.mxu0 %v4639_v58  ;;  %2772 = vmatpush1.bf16.msra.mxu1 %v4642_v59  ;;  %v4711_v58 = vld [vmem:[#allocation8 + $0xe0] ss:$8 sps:$4 sm:$0xff]   ;;  %v4716_v59 = vld [vmem:[#allocation8 + $0xf4] ss:$8 sps:$4 sm:$0xff]  }
 0x23b   :  { %2691 = vmatprep.subr.bf16.mxu0 %v4647_v1  ;;  %2773 = vmatprep.subr.bf16.mxu1 %v4650_v2  ;;  %v4714_v1 = vld [vmem:[#allocation8 + $0xf0] ss:$8 sps:$4 sm:$0xff]   ;;  %v4719_v2 = vld [vmem:[#allocation8 + $0x104] ss:$8 sps:$4 sm:$0xff]  }
 0x23e   :  { %2692 = vmatpush1.bf16.msra.mxu0 %v4645_v3  ;;  %2774 = vmatpush1.bf16.msra.mxu1 %v4648_v4  ;;  %v4765_v3 = vld [vmem:[#allocation10 + $0x40] sm:$0xff]  }
 0x23f   :  { %2693 = vmatprep.subr.bf16.mxu0 %v4653_v5  ;;  %2775 = vmatprep.subr.bf16.mxu1 %v4656_v6  ;;  %v4766_v4 = vld [vmem:[#allocation10] sm:$0xff]   ;;  %v4767_v5 = vld [vmem:[#allocation10 + $0x48] sm:$0xff]  }
 0x240   :  { %v4768_v6 = vld [vmem:[#allocation10 + $0x8] sm:$0xff]  }
 0x242   :  { %2694 = vmatpush1.bf16.msra.mxu0 %v4651_v8  ;;  %2776 = vmatpush1.bf16.msra.mxu1 %v4654_v9  ;;  %v4769_v8 = vld [vmem:[#allocation10 + $0x50] sm:$0xff]  }
 0x243   :  { %v1821_v15 = vpop.f32.mrb[4].mxu1  ;;  %2695 = vmatprep.subr.bf16.mxu0 %v4659_v11  ;;  %2777 = vmatprep.subr.bf16.mxu1 %v4662_v12  ;;  %v4770_v9 = vld [vmem:[#allocation10 + $0x10] sm:$0xff]   ;;  %v4772_v11 = vld [vmem:[#allocation10 + $0x18] sm:$0xff]   ;;  %v4773_v12 = vld [vmem:[#allocation10 + $0x60] sm:$0xff]  }
 0x244   :  { %v4085_v19 = vadd.f32 %v1821_v15, %v371_v10  ;;  %v1823_v20 = vpop.f32.mrb[5].mxu1  ;;  %v4771_v10 = vld [vmem:[#allocation10 + $0x58] sm:$0xff]   ;;  %v4775_v15 = vld [vmem:[#allocation10 + $0x68] sm:$0xff]  }
 0x245   :  { %v4086_v16 = vadd.f32 %v1823_v20, %v375_v13  ;;  %v1825_v22 = vpop.f32.mrb[6].mxu1  ;;  %v4774_v13 = vld [vmem:[#allocation10 + $0x20] sm:$0xff]  }
 0x246   :  { %v1826_v23 = vpop.f32.mrb[7].mxu1  ;;  %2696 = vmatpush1.bf16.msra.mxu0 %v4657_v17  ;;  %2778 = vmatpush1.bf16.msra.mxu1 %v4660_v18  ;;  %v1830_v62 = vmax.f32 %v4085_v19, 0.0  ;;  %v4776_v17 = vld [vmem:[#allocation10 + $0x28] sm:$0xff]  }
 0x247   :  { %v1831_v24 = vmax.f32 %v4086_v16, 0.0  ;;  %2697 = vmatprep.subr.bf16.mxu0 %v4665_v21  ;;  %2779 = vmatprep.subr.bf16.mxu1 %v4668_v14  ;;  %v5170_v18 = vld [vmem:[%s5212_s4] sm:$0xf] }
 0x248   :  { %v1834_v30 = vpack.c.bf16 %v1830_v62, %v1830_v62  ;;  %v1969_v19 = vrot.slane %v5170_v18, %v5143_v61  ;;  %v1973_v20 = vrot.slane %v5170_v18, %v5151_v63  ;;  %v1981_v21 = vrot.slane %v5170_v18, %v374_v0 }
 0x249   :  { %v1835_v27 = vpack.c.bf16 %v1831_v24, %v1831_v24 }
 0x24a   :  { %2698 = vmatpush1.bf16.msra.mxu0 %v4663_v25  ;;  %2780 = vmatpush1.bf16.msra.mxu1 %v4666_v26 }
 0x24b   :  { %2699 = vmatprep.mubr.bf16.mxu0 %v1835_v27  ;;  %2781 = vmatprep.mubr.bf16.mxu1 %v1835_v27 }
 0x24c   :  { %3194 = vmatprep.subr.bf16.mxu0 %v4671_v28  ;;  %4030 = vmatprep.subr.bf16.mxu1 %v4765_v3  ;;  %v1977_v3 = vrot.slane %v5170_v18, %v370_v7  ;;  %v4780_v7 = vld [vmem:[#allocation10 + $0x38] sm:$0xff]  }
 0x24d   :  { %2700 = vmatmul.mubr.bf16.vlgmr.msra.gmra.mrb[4].mxu0 %v1834_v30  ;;  %2782 = vmatmul.mubr.bf16.vlgmr.msra.gmra.mrb[8].mxu1 %v1834_v30 }
 0x24e   :  { %3195 = vmatpush1.bf16.msra.mxu0 %v4669_v29  ;;  %4031 = vmatpush3.bf16.msra.mxu1 %v4766_v4  ;;  %v4761_v4 = vld [vmem:[#allocation8 + $0x1e4] ss:$8 sps:$4 sm:$0xff]  }
 0x24f   :  { %3196 = vmatprep.subr.bf16.mxu0 %v4674_v31  ;;  %4032 = vmatprep.subr.bf16.mxu1 %v4767_v5  ;;  %v4759_v5 = vld [vmem:[#allocation8 + $0x1e0] ss:$8 sps:$4 sm:$0xff]  }
 0x252   :  { %3197 = vmatpush1.bf16.msra.mxu0 %v4672_v32  ;;  %4033 = vmatpush3.bf16.msra.mxu1 %v4768_v6 }
 0x253   :  { %3198 = vmatprep.subr.bf16.mxu0 %v4677_v36  ;;  %4034 = vmatprep.subr.bf16.mxu1 %v4769_v8  ;;  %v4764_v8 = vld [vmem:[#allocation8 + $0x1f4] ss:$8 sps:$4 sm:$0xff]  }
 0x256   :  { %3199 = vmatpush1.bf16.msra.mxu0 %v4675_v33  ;;  %4035 = vmatpush3.bf16.msra.mxu1 %v4770_v9  ;;  %v4717_v33 = vld [vmem:[#allocation8 + $0x100] ss:$8 sps:$4 sm:$0xff]   ;;  %v4762_v9 = vld [vmem:[#allocation8 + $0x1f0] ss:$8 sps:$4 sm:$0xff]  }
 0x257   :  { %3200 = vmatprep.subr.bf16.mxu0 %v4680_v34  ;;  %4036 = vmatprep.subr.bf16.mxu1 %v4771_v10 }
 0x25a   :  { %3201 = vmatpush1.bf16.msra.mxu0 %v4678_v35  ;;  %4037 = vmatpush3.bf16.msra.mxu1 %v4772_v11  ;;  %v4722_v35 = vld [vmem:[#allocation8 + $0x114] ss:$8 sps:$4 sm:$0xff]  }
 0x25b   :  { %3202 = vmatprep.subr.bf16.mxu0 %v4683_v37  ;;  %4038 = vmatprep.subr.bf16.mxu1 %v4773_v12  ;;  %v4720_v37 = vld [vmem:[#allocation8 + $0x110] ss:$8 sps:$4 sm:$0xff]  }
 0x25c   :  { %v4777_v12 = vld [vmem:[#allocation10 + $0x70] sm:$0xff]  }
 0x25e   :  { %3203 = vmatpush1.bf16.msra.mxu0 %v4681_v38  ;;  %4039 = vmatpush3.bf16.msra.mxu1 %v4774_v13  ;;  %v4725_v38 = vld [vmem:[#allocation8 + $0x124] ss:$8 sps:$4 sm:$0xff]   ;;  %v4778_v13 = vld [vmem:[#allocation10 + $0x30] sm:$0xff]  }
 0x25f   :  { %3204 = vmatprep.subr.bf16.mxu0 %v4686_v39  ;;  %4040 = vmatprep.subr.bf16.mxu1 %v4775_v15  ;;  %v4723_v39 = vld [vmem:[#allocation8 + $0x120] ss:$8 sps:$4 sm:$0xff]   ;;  %v4966_v15 = vmov 0.0  }
 0x262   :  { %3205 = vmatpush1.bf16.msra.mxu0 %v4684_v40  ;;  %4041 = vmatpush3.bf16.msra.mxu1 %v4776_v17  ;;  %v4728_v40 = vld [vmem:[#allocation8 + $0x134] ss:$8 sps:$4 sm:$0xff]   ;;  %v2862_v17 = vld [vmem:[%s5214_s6] sm:$0x3] }
 0x263   :  { %3206 = vmatprep.subr.bf16.mxu0 %v4689_v41  ;;  %v4726_v41 = vld [vmem:[#allocation8 + $0x130] ss:$8 sps:$4 sm:$0xff]   ;;  %4042 = vmatprep.subr.bf16.mxu1 %v4777_v12  ;;  %v2867_v18 = vrot.slane %v2862_v17, %v5143_v61 }
 0x264   :  { %v4783_v61 = vld [vmem:[#allocation11 + $0x10] sm:$0xff]  }
 0x266   :  { %3207 = vmatpush1.bf16.msra.mxu0 %v4687_v42  ;;  %v4731_v42 = vld [vmem:[#allocation8 + $0x144] ss:$8 sps:$4 sm:$0xff]   ;;  %4043 = vmatpush3.bf16.msra.mxu1 %v4778_v13 }
 0x267   :  { %3208 = vmatprep.subr.bf16.mxu0 %v4692_v43  ;;  %v4729_v43 = vld [vmem:[#allocation8 + $0x140] ss:$8 sps:$4 sm:$0xff]   ;;  %4044 = vmatprep.subr.bf16.mxu1 %v4779_v60 }
 0x26a   :  { %3209 = vmatpush1.bf16.msra.mxu0 %v4690_v44  ;;  %v4734_v44 = vld [vmem:[#allocation8 + $0x154] ss:$8 sps:$4 sm:$0xff]   ;;  %4045 = vmatpush3.bf16.msra.mxu1 %v4780_v7 }
 0x26b   :  { %3210 = vmatprep.subr.bf16.mxu0 %v4695_v45  ;;  %v4732_v45 = vld [vmem:[#allocation8 + $0x150] ss:$8 sps:$4 sm:$0xff]   ;;  %4061 = vmatprep.subr.bf16.mxu1 %v4966_v15 }
 0x26e   :  { %3211 = vmatpush1.bf16.msra.mxu0 %v4693_v46  ;;  %v4737_v46 = vld [vmem:[#allocation8 + $0x164] ss:$8 sps:$4 sm:$0xff]  }
 0x26f   :  { %3212 = vmatprep.subr.bf16.mxu0 %v4698_v47  ;;  %v4735_v47 = vld [vmem:[#allocation8 + $0x160] ss:$8 sps:$4 sm:$0xff]  }
 0x272   :  { %3213 = vmatpush1.bf16.msra.mxu0 %v4696_v48  ;;  %v4740_v48 = vld [vmem:[#allocation8 + $0x174] ss:$8 sps:$4 sm:$0xff]  }
 0x273   :  { %3214 = vmatprep.subr.bf16.mxu0 %v4701_v49  ;;  %v4738_v49 = vld [vmem:[#allocation8 + $0x170] ss:$8 sps:$4 sm:$0xff]  }
 0x276   :  { %3215 = vmatpush1.bf16.msra.mxu0 %v4699_v50  ;;  %v4743_v50 = vld [vmem:[#allocation8 + $0x184] ss:$8 sps:$4 sm:$0xff]  }
 0x277   :  { %3216 = vmatprep.subr.bf16.mxu0 %v4704_v51  ;;  %v4741_v51 = vld [vmem:[#allocation8 + $0x180] ss:$8 sps:$4 sm:$0xff]  }
 0x27a   :  { %3217 = vmatpush1.bf16.msra.mxu0 %v4702_v52  ;;  %v4746_v52 = vld [vmem:[#allocation8 + $0x194] ss:$8 sps:$4 sm:$0xff]  }
 0x27b   :  { %3218 = vmatprep.subr.bf16.mxu0 %v4707_v53  ;;  %v4744_v53 = vld [vmem:[#allocation8 + $0x190] ss:$8 sps:$4 sm:$0xff]  }
 0x27e   :  { %3219 = vmatpush1.bf16.msra.mxu0 %v4705_v54  ;;  %v4749_v54 = vld [vmem:[#allocation8 + $0x1a4] ss:$8 sps:$4 sm:$0xff]  }
 0x27f   :  { %3220 = vmatprep.subr.bf16.mxu0 %v4710_v55  ;;  %v4747_v55 = vld [vmem:[#allocation8 + $0x1a0] ss:$8 sps:$4 sm:$0xff]  }
 0x282   :  { %3221 = vmatpush1.bf16.msra.mxu0 %v4708_v56  ;;  %v4752_v56 = vld [vmem:[#allocation8 + $0x1b4] ss:$8 sps:$4 sm:$0xff]  }
 0x283   :  { %3222 = vmatprep.subr.bf16.mxu0 %v4713_v57  ;;  %v4750_v57 = vld [vmem:[#allocation8 + $0x1b0] ss:$8 sps:$4 sm:$0xff]  }
 0x286   :  { %3223 = vmatpush1.bf16.msra.mxu0 %v4711_v58  ;;  %v4755_v58 = vld [vmem:[#allocation8 + $0x1c4] ss:$8 sps:$4 sm:$0xff]  }
 0x287   :  { %3224 = vmatprep.subr.bf16.mxu0 %v4716_v59  ;;  %v4753_v59 = vld [vmem:[#allocation8 + $0x1c0] ss:$8 sps:$4 sm:$0xff]  }
 0x28a   :  { %3225 = vmatpush1.bf16.msra.mxu0 %v4714_v1  ;;  %v4758_v1 = vld [vmem:[#allocation8 + $0x1d4] ss:$8 sps:$4 sm:$0xff]  }
 0x28b   :  { %3235 = vmatprep.subr.bf16.mxu0 %v4719_v2  ;;  %v4756_v2 = vld [vmem:[#allocation8 + $0x1d0] ss:$8 sps:$4 sm:$0xff]  }
 0x320   :  { %v2701_v14 = vpop.f32.mrb[4].mxu0  ;;  %v5179_v16 = vpop.f32.mrb[8].mxu1 }
 0x321   :  { %v4087_v22 = vadd.f32 %v2701_v14, %v1969_v19  ;;  %v2703_v23 = vpop.f32.mrb[5].mxu0  ;;  %v2785_v24 = vpop.f32.mrb[9].mxu1  ;;  %v4089_v6 = vadd.f32 %v5179_v16, %v1977_v3  ;;  %v2871_v19 = vrot.slane %v2862_v17, %v5151_v63  ;;  %v4784_v63 = vld [vmem:[#allocation11 + $0x18] sm:$0xff]  }
 0x322   :  { %v4088_v25 = vadd.f32 %v2703_v23, %v1973_v20  ;;  %v4090_v26 = vadd.f32 %v2785_v24, %v1981_v21  ;;  %v2705_v62 = vpop.f32.mrb[6].mxu0  ;;  %v2787_v27 = vpop.f32.mrb[10].mxu1 }
 0x323   :  { %v2790_v28 = vmax.f32 %v4087_v22, 0.0  ;;  %v2706_v29 = vpop.f32.mrb[7].mxu0  ;;  %v2788_v30 = vpop.f32.mrb[11].mxu1  ;;  %v2792_v10 = vmax.f32 %v4089_v6, 0.0  ;;  %v4781_v62 = vld [vmem:[#allocation11] sm:$0xff]  }
 0x324   :  { %v2791_v31 = vmax.f32 %v4088_v25, 0.0  ;;  %v2793_v32 = vmax.f32 %v4090_v26, 0.0  ;;  %v4785_v29 = vld [vmem:[#allocation11 + $0x20] sm:$0xff]   ;;  %v4786_v30 = vld [vmem:[#allocation11 + $0x28] sm:$0xff]  }
 0x325   :  { %v2794_v34 = vpack.c.bf16 %v2790_v28, %v2790_v28  ;;  %v2796_v11 = vpack.c.bf16 %v2792_v10, %v2792_v10  ;;  %v4782_v28 = vld [vmem:[#allocation11 + $0x8] sm:$0xff]  }
 0x326   :  { %v2795_v36 = vpack.c.bf16 %v2791_v31, %v2791_v31  ;;  %v2797_v0 = vpack.c.bf16 %v2793_v32, %v2793_v32  ;;  %v4787_v31 = vld [vmem:[#allocation11 + $0x30] sm:$0xff]   ;;  %v4788_v32 = vld [vmem:[#allocation11 + $0x38] sm:$0xff]  }
 0x328   :  { %3226 = vmatprep.mubr.bf16.mxu0 %v2795_v36 }
 0x329   :  { %3227 = vmatmul.mubr.bf16.vlgmr.msra.gmra.mrb[8].mxu0 %v2794_v34 }
 0x32a   :  { %3236 = vmatpush1.bf16.msra.mxu0 %v4717_v33  ;;  %3267 = vmatprep.mubr.bf16.mxu0 %v2797_v0  ;;  %v4004_v33 = vld [vmem:[%s5216_s8] ss:$0 sm:$0xff]  ;;  %s4921_s8 = scalar_lea.vmem %s3577_s22, 128 }
 0x32b   :  { %3237 = vmatprep.subr.bf16.mxu0 %v4722_v35  ;;  %p4922_p6 = scmp.ne.s32.totalorder %s3577_s22, %s4921_s8  ;;  %p4927_p8 = scmp.lt.s32.totalorder %s4921_s8, %s4921_s8 }
 0x32d   :  { %p4928_p9 = por %p4927_p8, %p4926_p7 }
 0x32e   :  { %3238 = vmatpush1.bf16.msra.mxu0 %v4720_v37 }
 0x32f   :  { %3239 = vmatprep.subr.bf16.mxu0 %v4725_v38  ;;  %p4929_p10 = pnand %p4928_p9, %p4922_p6 }
 0x332   :  { %3240 = vmatpush1.bf16.msra.mxu0 %v4723_v39 }
 0x333   :  { %3241 = vmatprep.subr.bf16.mxu0 %v4728_v40 }
 0x336   :  { %3242 = vmatpush1.bf16.msra.mxu0 %v4726_v41  ;;  %v4021_v41 = vld [vmem:[%s5218_s10] ss:$0 sm:$0xff] }
 0x337   :  { %3243 = vmatprep.subr.bf16.mxu0 %v4731_v42 }
 0x33a   :  { %3244 = vmatpush1.bf16.msra.mxu0 %v4729_v43 }
 0x33b   :  { %3245 = vmatprep.subr.bf16.mxu0 %v4734_v44 }
 0x33e   :  { %3246 = vmatpush1.bf16.msra.mxu0 %v4732_v45 }
 0x33f   :  { %3247 = vmatprep.subr.bf16.mxu0 %v4737_v46 }
 0x342   :  { %3248 = vmatpush1.bf16.msra.mxu0 %v4735_v47 }
 0x343   :  { %3249 = vmatprep.subr.bf16.mxu0 %v4740_v48 }
 0x346   :  { %3250 = vmatpush1.bf16.msra.mxu0 %v4738_v49 }
 0x347   :  { %3251 = vmatprep.subr.bf16.mxu0 %v4743_v50 }
 0x34a   :  { %3252 = vmatpush1.bf16.msra.mxu0 %v4741_v51 }
 0x34b   :  { %3253 = vmatprep.subr.bf16.mxu0 %v4746_v52 }
 0x34e   :  { %3254 = vmatpush1.bf16.msra.mxu0 %v4744_v53 }
 0x34f   :  { %3255 = vmatprep.subr.bf16.mxu0 %v4749_v54 }
 0x352   :  { %3256 = vmatpush1.bf16.msra.mxu0 %v4747_v55 }
 0x353   :  { %3257 = vmatprep.subr.bf16.mxu0 %v4752_v56 }
 0x356   :  { %3258 = vmatpush1.bf16.msra.mxu0 %v4750_v57 }
 0x357   :  { %3259 = vmatprep.subr.bf16.mxu0 %v4755_v58 }
 0x35a   :  { %3260 = vmatpush1.bf16.msra.mxu0 %v4753_v59 }
 0x35b   :  { %3261 = vmatprep.subr.bf16.mxu0 %v4758_v1 }
 0x35e   :  { %3262 = vmatpush1.bf16.msra.mxu0 %v4756_v2 }
 0x35f   :  { %3263 = vmatprep.subr.bf16.mxu0 %v4761_v4 }
 0x362   :  { %3264 = vmatpush1.bf16.msra.mxu0 %v4759_v5 }
 0x363   :  { %3265 = vmatprep.subr.bf16.mxu0 %v4764_v8 }
 0x366   :  { %3266 = vmatpush1.bf16.msra.mxu0 %v4762_v9 }
 0x369   :  { %3268 = vmatmul.mubr.bf16.vlgmr.msra.gmra.mrb[8].mxu0 %v2796_v11 }
 0x43c   :  { %v3269_v20 = vpop.f32.mrb[8].mxu0 }
 0x43d   :  { %v4091_v21 = vadd.f32 %v3269_v20, %v2867_v18  ;;  %v3271_v14 = vpop.f32.mrb[9].mxu0 }
 0x43e   :  { %v4092_v16 = vadd.f32 %v3271_v14, %v2871_v19  ;;  %v3273_v22 = vpop.f32.mrb[10].mxu0 }
 0x43f   :  { %v3276_v23 = vmax.f32 %v4091_v21, 0.0  ;;  %v3274_v24 = vpop.f32.mrb[11].mxu0 }
 0x440   :  { %v3277_v25 = vmax.f32 %v4092_v16, 0.0 }
 0x441   :  { %v3278_v27 = vpack.c.bf16 %v3276_v23, %v3276_v23 }
 0x442   :  { %v3279_v26 = vpack.c.bf16 %v3277_v25, %v3277_v25 }
 0x444   :  { %3447 = vmatprep.mubr.bf16.mxu1 %v3279_v26 }
 0x445   :  { %3448 = vmatmul.mubr.bf16.vlgmr.msra.gmra.mrb[12].mxu1 %v3278_v27 }
 0x446   :  { %4062 = vmatpush3.bf16.msra.mxu1 %v4781_v62  ;;  %4077 = vmatprep.mubr.msk.bf16.mxu1 %vm4967_vm0, %v4966_v15 }
 0x447   :  { %4063 = vmatprep.subr.bf16.mxu1 %v4966_v15 }
 0x44a   :  { %4064 = vmatpush3.bf16.msra.mxu1 %v4782_v28 }
 0x44b   :  { %4065 = vmatprep.subr.bf16.mxu1 %v4966_v15 }
 0x44e   :  { %4066 = vmatpush3.bf16.msra.mxu1 %v4783_v61 }
 0x44f   :  { %4067 = vmatprep.subr.bf16.mxu1 %v4966_v15 }
 0x452   :  { %4068 = vmatpush3.bf16.msra.mxu1 %v4784_v63 }
 0x453   :  { %4069 = vmatprep.subr.bf16.mxu1 %v4966_v15 }
 0x456   :  { %4070 = vmatpush3.bf16.msra.mxu1 %v4785_v29 }
 0x457   :  { %4071 = vmatprep.subr.bf16.mxu1 %v4966_v15 }
 0x45a   :  { %4072 = vmatpush3.bf16.msra.mxu1 %v4786_v30 }
 0x45b   :  { %4073 = vmatprep.subr.bf16.mxu1 %v4966_v15 }
 0x45e   :  { %4074 = vmatpush3.bf16.msra.mxu1 %v4787_v31 }
 0x45f   :  { %4075 = vmatprep.subr.bf16.mxu1 %v4966_v15 }
 0x462   :  { %4076 = vmatpush3.bf16.msra.mxu1 %v4788_v32 }
 0x518   :  { %v4046_v36 = vpop.f32.mrb[12].mxu1 }
 0x519   :  { %v4047_v34 = vpop.f32.mrb[13].mxu1 }
 0x51a   :  { %v4048_v35 = vadd.f32 %v4047_v34, %v4046_v36  ;;  %v4049_v0 = vpop.f32.mrb[14].mxu1 }
 0x51b   :  { %v4050_v37 = vpop.f32.mrb[15].mxu1 }
 0x51c   :  { %v3450_v38 = vadd.f32 %v4048_v35, %v4004_v33 }
 0x51e   :  { %v3455_v39 = vmax.f32 %v3450_v38, 0.0 }
 0x520   :  { %v3456_v40 = vpack.c.bf16 %v3455_v39, %v3455_v39 }
 0x522   :  { %4078 = vmatmul.mubr.bf16.vlgmr.msra.gmra.mrb[16].mxu1 %v3456_v40 }
 0x5f5   :  { %v3562_v42 = vpop.f32.mrb[16].mxu1 }
 0x5f6   :  { %v3563_v43 = vadd.f32 %v4021_v41, %v3562_v42  ;;  %v4079_v44 = vpop.f32.mrb[17].mxu1 }
 0x5f7   :  { %v3565_v45 = vpop.f32.mrb[18].mxu1 }
 0x5f8   :  { %v3568_v46 = vmax.f32 %v3563_v43, 0.0  ;;  %v4080_v47 = vpop.f32.mrb[19].mxu1 }
 0x5fa   :  { %3569 = vst [vmem:[#allocation13] sm:$0xff] %v3568_v46 }
 0x5fb   :  { %4932 = shalt.err (!%p4929_p10)
}
 0x5fc   :  { %s4933_s10 = scalar_lea.hbm %s5219_s11, 128 }
 0x5fd   :  { %p4934_p11 = scmp.ne.s32.totalorder %s5219_s11, %s4933_s10  ;;  %p4937_p12 = scmp.lt.u32.totalorder %s4933_s10, %s5219_s11 }
 0x5ff   :  { %p4939_p13 = pnand %p4937_p12, %p4934_p11 }
 0x601   :  { %4942 = shalt.err (!%p4939_p13)
}
 0x602   :  { %3579 = dma.vmem_to_hbm [thread:$0]  %s3577_s22, 128, %s5219_s11, [#allocation4]  }
 0x603   :  { %4951 = dma.done.wait [#allocation4], 128  }
 0x604   :  { %4952 = vsyncadd [#allocation4], 4294967168 }
 0x605   :  { %3583 = vsyncpa [#allocation3], 1 }
 0x606   :  { %3584 = vsyncpa [#allocation6], 1 }
 0x607   :  { %3585 = vsyncpa [#allocation9], 1 }
 0x608   :  { %3586 = vsyncpa [#allocation12], 1 }
 0x609   :  { %3587 = vsyncpa [#allocation4], 1 }

</bundles_post_ra>
